<compile_context>
chip_gen: v7x
topology: tpu7x:2x2x1
jax: 0.10.0
libtpu: 0.0.40
codegen_flags: <defaults>
</compile_context>

<pallas_src>
import math

import jax
import jax.numpy as jnp
from jax.experimental import pallas as pl
from jax.experimental.pallas import tpu as pltpu

# ----------------------------- config --------------------------------------
VOCAB = 128
TYPE_VOCAB = 2
MAX_POS = 64
HIDDEN = 32
N_HEADS = 4
HEAD_DIM = HIDDEN // N_HEADS
INTERMEDIATE = 64
N_LAYERS = 2
BATCH = 2
SEQ = 8
TOKENS = BATCH * SEQ
LN_EPS = 1e-12
LANE = 128

# Packed small-vector layout: row 0/1 = embedding LN gamma/beta, then
# VECS_PER_LAYER rows per layer: [bqkv, bo, g1, be1, b1, b2, g2, be2].
VECS_PER_LAYER = 8
N_VEC_ROWS = 2 + N_LAYERS * VECS_PER_LAYER


# --------------------------- kernel helpers ---------------------------------
def _layernorm(x, gamma, beta):
    mean = jnp.mean(x, axis=-1, keepdims=True)
    var = jnp.mean((x - mean) ** 2, axis=-1, keepdims=True)
    return (x - mean) * jax.lax.rsqrt(var + LN_EPS) * gamma + beta


def _gelu(x):
    # TODO(synk): HF BERT default is exact erf GELU; the tanh approximation is
    # used here for a guaranteed Mosaic element-wise lowering.
    c = math.sqrt(2.0 / math.pi)
    return 0.5 * x * (1.0 + jnp.tanh(c * (x + 0.044715 * x * x * x)))


# --------------------------- fused encoder kernel ---------------------------
def encoder_kernel(x_ref, mask_ref, vec_ref, wqkv_ref, wo_ref, w1_ref, w2_ref,
                   o_ref):
    def vec2(row, n):
        # (1, n) f32 slice of the packed small-vector blob.
        return vec_ref[row:row + 1, 0:n]

    # ---- embedding LayerNorm prologue ----
    x = _layernorm(x_ref[...], vec2(0, HIDDEN), vec2(1, HIDDEN))     # (T,H) f32

    # Additive attention mask, broadcast ONCE for all layers / heads.
    mask_b = jnp.broadcast_to(mask_ref[...][None, :, None, :],
                              (N_HEADS, BATCH, SEQ, SEQ))
    scale = 1.0 / math.sqrt(HEAD_DIM)

    # ---- static layer loop: whole model is resident in VMEM ----
    for l in range(N_LAYERS):
        base = 2 + l * VECS_PER_LAYER
        bqkv = vec2(base + 0, 3 * HIDDEN)
        bo = vec2(base + 1, HIDDEN)
        g1 = vec2(base + 2, HIDDEN)
        be1 = vec2(base + 3, HIDDEN)
        b1 = vec2(base + 4, INTERMEDIATE)
        b2 = vec2(base + 5, HIDDEN)
        g2 = vec2(base + 6, HIDDEN)
        be2 = vec2(base + 7, HIDDEN)

        # fused QKV projection: one (T,H)@(H,3H) MXU push, bf16 operands.
        qkv = jnp.dot(x.astype(jnp.bfloat16), wqkv_ref[l],
                      preferred_element_type=jnp.float32) + bqkv      # (T,3H)

        q = (qkv[:, 0 * HIDDEN:1 * HIDDEN] * scale).reshape(BATCH, SEQ, HIDDEN)
        k = qkv[:, 1 * HIDDEN:2 * HIDDEN].reshape(BATCH, SEQ, HIDDEN)
        v = qkv[:, 2 * HIDDEN:3 * HIDDEN].reshape(BATCH, SEQ, HIDDEN)
        q_bf = q.astype(jnp.bfloat16)
        k_bf = k.astype(jnp.bfloat16)
        v_bf = v.astype(jnp.bfloat16)

        # Per-head score matmuls (tiny bf16 MXU dots), stacked on a leading
        # axis so the softmax (mask-add / max / exp / sum / divide) runs ONCE
        # for all heads instead of 4x EUP/XLU passes.
        s = jnp.stack(
            [jnp.einsum('bqd,bkd->bqk',
                        q_bf[:, :, h * HEAD_DIM:(h + 1) * HEAD_DIM],
                        k_bf[:, :, h * HEAD_DIM:(h + 1) * HEAD_DIM],
                        preferred_element_type=jnp.float32)
             for h in range(N_HEADS)], axis=0)                        # (nh,B,S,S)
        s = s + mask_b
        s = s - jnp.max(s, axis=-1, keepdims=True)
        p = jnp.exp(s)
        p = p / jnp.sum(p, axis=-1, keepdims=True)     # exact softmax denom
        p_bf = p.astype(jnp.bfloat16)

        # ctx @ Wo accumulated per head -> avoids a lane-axis concat of the
        # (B,S,HEAD_DIM) head outputs.
        attn = jnp.zeros((TOKENS, HIDDEN), jnp.float32)
        for h in range(N_HEADS):
            lo = h * HEAD_DIM
            hi = lo + HEAD_DIM
            ctx_h = jnp.einsum('bqk,bkd->bqd', p_bf[h], v_bf[:, :, lo:hi],
                               preferred_element_type=jnp.float32)
            ctx_h = ctx_h.reshape(TOKENS, HEAD_DIM).astype(jnp.bfloat16)
            attn = attn + jnp.dot(ctx_h, wo_ref[l, lo:hi, :],
                                  preferred_element_type=jnp.float32)

        x = _layernorm(x + attn + bo, g1, be1)

        # feed-forward (bf16 dot operands, f32 accumulation + element-wise)
        ff = _gelu(jnp.dot(x.astype(jnp.bfloat16), w1_ref[l],
                           preferred_element_type=jnp.float32) + b1)
        ff = jnp.dot(ff.astype(jnp.bfloat16), w2_ref[l],
                     preferred_element_type=jnp.float32) + b2

        x = _layernorm(x + ff, g2, be2)

    o_ref[...] = x


# --------------------------- pallas_call wrapper -----------------------------
# Single invocation, no grid: every operand is a full-array block resident in
# VMEM for the whole kernel (total footprint ~50 KB).
_encoder_call = pl.pallas_call(
    encoder_kernel,
    out_shape=jax.ShapeDtypeStruct((TOKENS, HIDDEN), jnp.float32),
    compiler_params=pltpu.CompilerParams(vmem_limit_bytes=16 * 1024 * 1024),
)


# --------------------------- parameter init ----------------------------------
def init_params(key):
    def norm(k, shape, std=0.02):
        return std * jax.random.normal(k, shape, dtype=jnp.float32)

    keys = jax.random.split(key, 7)
    return {
        "word_emb": norm(keys[0], (VOCAB, HIDDEN)),
        "pos_emb": norm(keys[1], (MAX_POS, HIDDEN)),
        "type_emb": norm(keys[2], (TYPE_VOCAB, HIDDEN)),
        "emb_gamma": jnp.ones((HIDDEN,), jnp.float32),
        "emb_beta": jnp.zeros((HIDDEN,), jnp.float32),
        # per-layer parameters stacked on a leading layer axis
        "wqkv": norm(keys[3], (N_LAYERS, HIDDEN, 3 * HIDDEN)),
        "bqkv": jnp.zeros((N_LAYERS, 3 * HIDDEN), jnp.float32),
        "wo": norm(keys[4], (N_LAYERS, HIDDEN, HIDDEN)),
        "bo": jnp.zeros((N_LAYERS, HIDDEN), jnp.float32),
        "g1": jnp.ones((N_LAYERS, HIDDEN), jnp.float32),
        "be1": jnp.zeros((N_LAYERS, HIDDEN), jnp.float32),
        "w1": norm(keys[5], (N_LAYERS, HIDDEN, INTERMEDIATE)),
        "b1": jnp.zeros((N_LAYERS, INTERMEDIATE), jnp.float32),
        "w2": norm(keys[6], (N_LAYERS, INTERMEDIATE, HIDDEN)),
        "b2": jnp.zeros((N_LAYERS, HIDDEN), jnp.float32),
        "g2": jnp.ones((N_LAYERS, HIDDEN), jnp.float32),
        "be2": jnp.zeros((N_LAYERS, HIDDEN), jnp.float32),
    }


def _pack_vecs(params):
    """Pack all small vectors into one lane-padded (N_VEC_ROWS, 128) f32 blob."""
    rows = [params["emb_gamma"], params["emb_beta"]]
    for l in range(N_LAYERS):
        rows += [params["bqkv"][l], params["bo"][l], params["g1"][l],
                 params["be1"][l], params["b1"][l], params["b2"][l],
                 params["g2"][l], params["be2"][l]]
    padded = [jnp.pad(r.reshape(1, -1), ((0, 0), (0, LANE - r.shape[-1])))
              for r in rows]
    return jnp.concatenate(padded, axis=0).astype(jnp.float32)


# --------------------------- forward (TextEncoder.forward) -------------------
@jax.jit
def text_encoder_forward(params, input_ids, attention_mask):
    B, S = input_ids.shape
    # Embedding lookup (glue, plain JAX): word + position + token-type(=0).
    x = (params["word_emb"][input_ids]
         + params["pos_emb"][None, :S, :]
         + params["type_emb"][0][None, None, :]).astype(jnp.float32)

    # additive attention mask, HF-BERT convention
    add_mask = (1.0 - attention_mask.astype(jnp.float32)) * -10000.0

    hidden = _encoder_call(
        x.reshape(B * S, HIDDEN), add_mask, _pack_vecs(params),
        params["wqkv"].astype(jnp.bfloat16),
        params["wo"].astype(jnp.bfloat16),
        params["w1"].astype(jnp.bfloat16),
        params["w2"].astype(jnp.bfloat16))

    # encoded_text.last_hidden_state[:, 0, :]  (CLS token)
    return hidden.reshape(B, S, HIDDEN)[:, 0, :]


# TODO(synk): loading real pretrained HF BERT weights / the tokenizer has no
# Pallas equivalent; parameters are synthetic and initialized deterministically.

if __name__ == "__main__":
    key = jax.random.PRNGKey(0)
    pkey, ikey = jax.random.split(key)
    params = init_params(pkey)

    input_ids = jax.random.randint(ikey, (BATCH, SEQ), 0, VOCAB, dtype=jnp.int32)
    attention_mask = jnp.array([[1, 1, 1, 1, 1, 1, 1, 1],
                                [1, 1, 1, 1, 1, 1, 0, 0]], dtype=jnp.int32)

    out = text_encoder_forward(params, input_ids, attention_mask)
    out = jax.block_until_ready(out)
    assert out.shape == (BATCH, HIDDEN)
    assert jnp.all(jnp.isfinite(out))
    print("KERNEL_OK")
</pallas_src>

<mosaic_0001>
module attributes {stable_mosaic.version = 11 : i64} {
  func.func @encoder_kernel(%arg0: memref<16x32xf32, #tpu.memory_space<vmem>>, %arg1: memref<2x8xf32, #tpu.memory_space<vmem>>, %arg2: memref<18x128xf32, #tpu.memory_space<vmem>>, %arg3: memref<2x32x96xbf16, #tpu.memory_space<vmem>>, %arg4: memref<2x32x32xbf16, #tpu.memory_space<vmem>>, %arg5: memref<2x32x64xbf16, #tpu.memory_space<vmem>>, %arg6: memref<2x64x32xbf16, #tpu.memory_space<vmem>>, %arg7: memref<16x32xf32, #tpu.memory_space<vmem>>) attributes {dimension_semantics = [], scalar_prefetch = 0 : i64, scratch_operands = 0 : i64, tpu.core_type = #tpu.core_type<tc>} {
    %c0 = arith.constant 0 : index
    %c0_0 = arith.constant 0 : index
    %0 = vector.load %arg0[%c0, %c0_0] : memref<16x32xf32, #tpu.memory_space<vmem>>, vector<16x32xf32>
    %c0_1 = arith.constant 0 : index
    %c0_2 = arith.constant 0 : index
    %1 = vector.load %arg2[%c0_1, %c0_2] : memref<18x128xf32, #tpu.memory_space<vmem>>, vector<1x32xf32>
    %c1 = arith.constant 1 : index
    %c0_3 = arith.constant 0 : index
    %2 = vector.load %arg2[%c1, %c0_3] : memref<18x128xf32, #tpu.memory_space<vmem>>, vector<1x32xf32>
    %cst = arith.constant dense<0.000000e+00> : vector<16xf32>
    %3 = vector.multi_reduction <add>, %0, %cst [1] : vector<16x32xf32> to vector<16xf32>
    %4 = vector.shape_cast %3 : vector<16xf32> to vector<16x1xf32>
    %cst_4 = arith.constant 3.200000e+01 : f32
    %5 = vector.broadcast %cst_4 : f32 to vector<16x1xf32>
    %6 = arith.divf %4, %5 : vector<16x1xf32>
    %7 = vector.broadcast %6 : vector<16x1xf32> to vector<16x32xf32>
    %8 = arith.subf %0, %7 : vector<16x32xf32>
    %9 = arith.mulf %8, %8 : vector<16x32xf32>
    %cst_5 = arith.constant dense<0.000000e+00> : vector<16xf32>
    %10 = vector.multi_reduction <add>, %9, %cst_5 [1] : vector<16x32xf32> to vector<16xf32>
    %11 = vector.shape_cast %10 : vector<16xf32> to vector<16x1xf32>
    %cst_6 = arith.constant 3.200000e+01 : f32
    %12 = vector.broadcast %cst_6 : f32 to vector<16x1xf32>
    %13 = arith.divf %11, %12 : vector<16x1xf32>
    %14 = vector.broadcast %6 : vector<16x1xf32> to vector<16x32xf32>
    %15 = arith.subf %0, %14 : vector<16x32xf32>
    %cst_7 = arith.constant 9.99999996E-13 : f32
    %16 = vector.broadcast %cst_7 : f32 to vector<16x1xf32>
    %17 = arith.addf %13, %16 : vector<16x1xf32>
    %18 = math.rsqrt %17 : vector<16x1xf32>
    %19 = vector.broadcast %18 : vector<16x1xf32> to vector<16x32xf32>
    %20 = arith.mulf %15, %19 : vector<16x32xf32>
    %21 = vector.broadcast %1 : vector<1x32xf32> to vector<16x32xf32>
    %22 = arith.mulf %20, %21 : vector<16x32xf32>
    %23 = vector.broadcast %2 : vector<1x32xf32> to vector<16x32xf32>
    %24 = arith.addf %22, %23 : vector<16x32xf32>
    %c0_8 = arith.constant 0 : index
    %c0_9 = arith.constant 0 : index
    %25 = vector.load %arg1[%c0_8, %c0_9] : memref<2x8xf32, #tpu.memory_space<vmem>>, vector<2x8xf32>
    %26 = vector.shape_cast %25 : vector<2x8xf32> to vector<1x2x1x8xf32>
    %27 = vector.shape_cast %26 : vector<1x2x1x8xf32> to vector<1x2x1x8xf32>
    %28 = vector.broadcast %27 : vector<1x2x1x8xf32> to vector<4x2x8x8xf32>
    %c2 = arith.constant 2 : index
    %c0_10 = arith.constant 0 : index
    %29 = vector.load %arg2[%c2, %c0_10] : memref<18x128xf32, #tpu.memory_space<vmem>>, vector<1x96xf32>
    %c3 = arith.constant 3 : index
    %c0_11 = arith.constant 0 : index
    %30 = vector.load %arg2[%c3, %c0_11] : memref<18x128xf32, #tpu.memory_space<vmem>>, vector<1x32xf32>
    %c4 = arith.constant 4 : index
    %c0_12 = arith.constant 0 : index
    %31 = vector.load %arg2[%c4, %c0_12] : memref<18x128xf32, #tpu.memory_space<vmem>>, vector<1x32xf32>
    %c5 = arith.constant 5 : index
    %c0_13 = arith.constant 0 : index
    %32 = vector.load %arg2[%c5, %c0_13] : memref<18x128xf32, #tpu.memory_space<vmem>>, vector<1x32xf32>
    %c6 = arith.constant 6 : index
    %c0_14 = arith.constant 0 : index
    %33 = vector.load %arg2[%c6, %c0_14] : memref<18x128xf32, #tpu.memory_space<vmem>>, vector<1x64xf32>
    %c7 = arith.constant 7 : index
    %c0_15 = arith.constant 0 : index
    %34 = vector.load %arg2[%c7, %c0_15] : memref<18x128xf32, #tpu.memory_space<vmem>>, vector<1x32xf32>
    %c8 = arith.constant 8 : index
    %c0_16 = arith.constant 0 : index
    %35 = vector.load %arg2[%c8, %c0_16] : memref<18x128xf32, #tpu.memory_space<vmem>>, vector<1x32xf32>
    %c9 = arith.constant 9 : index
    %c0_17 = arith.constant 0 : index
    %36 = vector.load %arg2[%c9, %c0_17] : memref<18x128xf32, #tpu.memory_space<vmem>>, vector<1x32xf32>
    %37 = arith.truncf %24 : vector<16x32xf32> to vector<16x32xbf16>
    %c0_18 = arith.constant 0 : index
    %c0_19 = arith.constant 0 : index
    %c0_20 = arith.constant 0 : index
    %38 = vector.load %arg3[%c0_18, %c0_19, %c0_20] : memref<2x32x96xbf16, #tpu.memory_space<vmem>>, vector<1x32x96xbf16>
    %39 = vector.shape_cast %38 : vector<1x32x96xbf16> to vector<32x96xbf16>
    %cst_21 = arith.constant dense<0.000000e+00> : vector<16x96xf32>
    %40 = tpu.matmul %37, %39, %cst_21 {dimension_numbers = #tpu.dot_dimension_numbers<[1], [0], [0], [1], [0, 0, 1, 1], [], []>} : vector<16x32xbf16>, vector<32x96xbf16>, vector<16x96xf32> -> vector<16x96xf32>
    %41 = vector.broadcast %29 : vector<1x96xf32> to vector<16x96xf32>
    %42 = arith.addf %40, %41 : vector<16x96xf32>
    %43 = vector.extract_strided_slice %42 {offsets = [0, 0], sizes = [16, 32], strides = [1, 1]} : vector<16x96xf32> to vector<16x32xf32>
    %cst_22 = arith.constant 0.353553385 : f32
    %44 = vector.broadcast %cst_22 : f32 to vector<16x32xf32>
    %45 = arith.mulf %43, %44 : vector<16x32xf32>
    %46 = vector.shape_cast %45 : vector<16x32xf32> to vector<2x8x32xf32>
    %47 = vector.extract_strided_slice %42 {offsets = [0, 32], sizes = [16, 32], strides = [1, 1]} : vector<16x96xf32> to vector<16x32xf32>
    %48 = vector.shape_cast %47 : vector<16x32xf32> to vector<2x8x32xf32>
    %49 = vector.extract_strided_slice %42 {offsets = [0, 64], sizes = [16, 32], strides = [1, 1]} : vector<16x96xf32> to vector<16x32xf32>
    %50 = vector.shape_cast %49 : vector<16x32xf32> to vector<2x8x32xf32>
    %51 = arith.truncf %46 : vector<2x8x32xf32> to vector<2x8x32xbf16>
    %52 = arith.truncf %48 : vector<2x8x32xf32> to vector<2x8x32xbf16>
    %53 = arith.truncf %50 : vector<2x8x32xf32> to vector<2x8x32xbf16>
    %54 = vector.extract_strided_slice %51 {offsets = [0, 0, 0], sizes = [2, 8, 8], strides = [1, 1, 1]} : vector<2x8x32xbf16> to vector<2x8x8xbf16>
    %55 = vector.extract_strided_slice %52 {offsets = [0, 0, 0], sizes = [2, 8, 8], strides = [1, 1, 1]} : vector<2x8x32xbf16> to vector<2x8x8xbf16>
    "tpu.trace_start"() <{level = 10 : i32, message = "bqd,bkd->bqk"}> : () -> ()
    %cst_23 = arith.constant dense<0.000000e+00> : vector<2x8x8xf32>
    %56 = tpu.matmul %54, %55, %cst_23 {dimension_numbers = #tpu.dot_dimension_numbers<[2], [2], [1], [1], [0, 0, 0, 1, 1, 1], [0], [0]>} : vector<2x8x8xbf16>, vector<2x8x8xbf16>, vector<2x8x8xf32> -> vector<2x8x8xf32>
    "tpu.trace_stop"() : () -> ()
    %57 = vector.extract_strided_slice %51 {offsets = [0, 0, 8], sizes = [2, 8, 8], strides = [1, 1, 1]} : vector<2x8x32xbf16> to vector<2x8x8xbf16>
    %58 = vector.extract_strided_slice %52 {offsets = [0, 0, 8], sizes = [2, 8, 8], strides = [1, 1, 1]} : vector<2x8x32xbf16> to vector<2x8x8xbf16>
    "tpu.trace_start"() <{level = 10 : i32, message = "bqd,bkd->bqk"}> : () -> ()
    %cst_24 = arith.constant dense<0.000000e+00> : vector<2x8x8xf32>
    %59 = tpu.matmul %57, %58, %cst_24 {dimension_numbers = #tpu.dot_dimension_numbers<[2], [2], [1], [1], [0, 0, 0, 1, 1, 1], [0], [0]>} : vector<2x8x8xbf16>, vector<2x8x8xbf16>, vector<2x8x8xf32> -> vector<2x8x8xf32>
    "tpu.trace_stop"() : () -> ()
    %60 = vector.extract_strided_slice %51 {offsets = [0, 0, 16], sizes = [2, 8, 8], strides = [1, 1, 1]} : vector<2x8x32xbf16> to vector<2x8x8xbf16>
    %61 = vector.extract_strided_slice %52 {offsets = [0, 0, 16], sizes = [2, 8, 8], strides = [1, 1, 1]} : vector<2x8x32xbf16> to vector<2x8x8xbf16>
    "tpu.trace_start"() <{level = 10 : i32, message = "bqd,bkd->bqk"}> : () -> ()
    %cst_25 = arith.constant dense<0.000000e+00> : vector<2x8x8xf32>
    %62 = tpu.matmul %60, %61, %cst_25 {dimension_numbers = #tpu.dot_dimension_numbers<[2], [2], [1], [1], [0, 0, 0, 1, 1, 1], [0], [0]>} : vector<2x8x8xbf16>, vector<2x8x8xbf16>, vector<2x8x8xf32> -> vector<2x8x8xf32>
    "tpu.trace_stop"() : () -> ()
    %63 = vector.extract_strided_slice %51 {offsets = [0, 0, 24], sizes = [2, 8, 8], strides = [1, 1, 1]} : vector<2x8x32xbf16> to vector<2x8x8xbf16>
    %64 = vector.extract_strided_slice %52 {offsets = [0, 0, 24], sizes = [2, 8, 8], strides = [1, 1, 1]} : vector<2x8x32xbf16> to vector<2x8x8xbf16>
    "tpu.trace_start"() <{level = 10 : i32, message = "bqd,bkd->bqk"}> : () -> ()
    %cst_26 = arith.constant dense<0.000000e+00> : vector<2x8x8xf32>
    %65 = tpu.matmul %63, %64, %cst_26 {dimension_numbers = #tpu.dot_dimension_numbers<[2], [2], [1], [1], [0, 0, 0, 1, 1, 1], [0], [0]>} : vector<2x8x8xbf16>, vector<2x8x8xbf16>, vector<2x8x8xf32> -> vector<2x8x8xf32>
    "tpu.trace_stop"() : () -> ()
    %66 = vector.shape_cast %56 : vector<2x8x8xf32> to vector<1x2x8x8xf32>
    %67 = vector.shape_cast %59 : vector<2x8x8xf32> to vector<1x2x8x8xf32>
    %68 = vector.shape_cast %62 : vector<2x8x8xf32> to vector<1x2x8x8xf32>
    %69 = vector.shape_cast %65 : vector<2x8x8xf32> to vector<1x2x8x8xf32>
    %70 = tpu.concatenate %66, %67, %68, %69 in 0 : vector<1x2x8x8xf32>, vector<1x2x8x8xf32>, vector<1x2x8x8xf32>, vector<1x2x8x8xf32> -> vector<4x2x8x8xf32>
    %71 = arith.addf %70, %28 : vector<4x2x8x8xf32>
    %cst_27 = arith.constant dense<0xFF800000> : vector<4x2x8xf32>
    %72 = vector.multi_reduction <maximumf>, %71, %cst_27 [3] : vector<4x2x8x8xf32> to vector<4x2x8xf32>
    %73 = vector.shape_cast %72 : vector<4x2x8xf32> to vector<4x2x8x1xf32>
    %74 = vector.broadcast %73 : vector<4x2x8x1xf32> to vector<4x2x8x8xf32>
    %75 = arith.subf %71, %74 : vector<4x2x8x8xf32>
    %76 = math.exp %75 : vector<4x2x8x8xf32>
    %cst_28 = arith.constant dense<0.000000e+00> : vector<4x2x8xf32>
    %77 = vector.multi_reduction <add>, %76, %cst_28 [3] : vector<4x2x8x8xf32> to vector<4x2x8xf32>
    %78 = vector.shape_cast %77 : vector<4x2x8xf32> to vector<4x2x8x1xf32>
    %79 = vector.broadcast %78 : vector<4x2x8x1xf32> to vector<4x2x8x8xf32>
    %80 = arith.divf %76, %79 : vector<4x2x8x8xf32>
    %81 = arith.truncf %80 : vector<4x2x8x8xf32> to vector<4x2x8x8xbf16>
    %cst_29 = arith.constant 0.000000e+00 : f32
    %82 = vector.broadcast %cst_29 : f32 to vector<16x32xf32>
    %83 = vector.extract_strided_slice %81 {offsets = [0, 0, 0, 0], sizes = [1, 2, 8, 8], strides = [1, 1, 1, 1]} : vector<4x2x8x8xbf16> to vector<1x2x8x8xbf16>
    %84 = vector.shape_cast %83 : vector<1x2x8x8xbf16> to vector<2x8x8xbf16>
    %85 = vector.extract_strided_slice %53 {offsets = [0, 0, 0], sizes = [2, 8, 8], strides = [1, 1, 1]} : vector<2x8x32xbf16> to vector<2x8x8xbf16>
    "tpu.trace_start"() <{level = 10 : i32, message = "bqk,bkd->bqd"}> : () -> ()
    %cst_30 = arith.constant dense<0.000000e+00> : vector<2x8x8xf32>
    %86 = tpu.matmul %84, %85, %cst_30 {dimension_numbers = #tpu.dot_dimension_numbers<[2], [1], [1], [2], [0, 0, 0, 1, 1, 2], [0], [0]>} : vector<2x8x8xbf16>, vector<2x8x8xbf16>, vector<2x8x8xf32> -> vector<2x8x8xf32>
    "tpu.trace_stop"() : () -> ()
    %87 = vector.shape_cast %86 : vector<2x8x8xf32> to vector<16x8xf32>
    %88 = arith.truncf %87 : vector<16x8xf32> to vector<16x8xbf16>
    %c0_31 = arith.constant 0 : index
    %c0_32 = arith.constant 0 : index
    %c0_33 = arith.constant 0 : index
    %89 = vector.load %arg4[%c0_31, %c0_32, %c0_33] : memref<2x32x32xbf16, #tpu.memory_space<vmem>>, vector<1x8x32xbf16>
    %90 = vector.shape_cast %89 : vector<1x8x32xbf16> to vector<8x32xbf16>
    %cst_34 = arith.constant dense<0.000000e+00> : vector<16x32xf32>
    %91 = tpu.matmul %88, %90, %cst_34 {dimension_numbers = #tpu.dot_dimension_numbers<[1], [0], [0], [1], [0, 0, 1, 1], [], []>} : vector<16x8xbf16>, vector<8x32xbf16>, vector<16x32xf32> -> vector<16x32xf32>
    %92 = arith.addf %82, %91 : vector<16x32xf32>
    %93 = vector.extract_strided_slice %81 {offsets = [1, 0, 0, 0], sizes = [1, 2, 8, 8], strides = [1, 1, 1, 1]} : vector<4x2x8x8xbf16> to vector<1x2x8x8xbf16>
    %94 = vector.shape_cast %93 : vector<1x2x8x8xbf16> to vector<2x8x8xbf16>
    %95 = vector.extract_strided_slice %53 {offsets = [0, 0, 8], sizes = [2, 8, 8], strides = [1, 1, 1]} : vector<2x8x32xbf16> to vector<2x8x8xbf16>
    "tpu.trace_start"() <{level = 10 : i32, message = "bqk,bkd->bqd"}> : () -> ()
    %cst_35 = arith.constant dense<0.000000e+00> : vector<2x8x8xf32>
    %96 = tpu.matmul %94, %95, %cst_35 {dimension_numbers = #tpu.dot_dimension_numbers<[2], [1], [1], [2], [0, 0, 0, 1, 1, 2], [0], [0]>} : vector<2x8x8xbf16>, vector<2x8x8xbf16>, vector<2x8x8xf32> -> vector<2x8x8xf32>
    "tpu.trace_stop"() : () -> ()
    %97 = vector.shape_cast %96 : vector<2x8x8xf32> to vector<16x8xf32>
    %98 = arith.truncf %97 : vector<16x8xf32> to vector<16x8xbf16>
    %c0_36 = arith.constant 0 : index
    %c8_37 = arith.constant 8 : index
    %c0_38 = arith.constant 0 : index
    %99 = vector.load %arg4[%c0_36, %c8_37, %c0_38] : memref<2x32x32xbf16, #tpu.memory_space<vmem>>, vector<1x8x32xbf16>
    %100 = vector.shape_cast %99 : vector<1x8x32xbf16> to vector<8x32xbf16>
    %cst_39 = arith.constant dense<0.000000e+00> : vector<16x32xf32>
    %101 = tpu.matmul %98, %100, %cst_39 {dimension_numbers = #tpu.dot_dimension_numbers<[1], [0], [0], [1], [0, 0, 1, 1], [], []>} : vector<16x8xbf16>, vector<8x32xbf16>, vector<16x32xf32> -> vector<16x32xf32>
    %102 = arith.addf %92, %101 : vector<16x32xf32>
    %103 = vector.extract_strided_slice %81 {offsets = [2, 0, 0, 0], sizes = [1, 2, 8, 8], strides = [1, 1, 1, 1]} : vector<4x2x8x8xbf16> to vector<1x2x8x8xbf16>
    %104 = vector.shape_cast %103 : vector<1x2x8x8xbf16> to vector<2x8x8xbf16>
    %105 = vector.extract_strided_slice %53 {offsets = [0, 0, 16], sizes = [2, 8, 8], strides = [1, 1, 1]} : vector<2x8x32xbf16> to vector<2x8x8xbf16>
    "tpu.trace_start"() <{level = 10 : i32, message = "bqk,bkd->bqd"}> : () -> ()
    %cst_40 = arith.constant dense<0.000000e+00> : vector<2x8x8xf32>
    %106 = tpu.matmul %104, %105, %cst_40 {dimension_numbers = #tpu.dot_dimension_numbers<[2], [1], [1], [2], [0, 0, 0, 1, 1, 2], [0], [0]>} : vector<2x8x8xbf16>, vector<2x8x8xbf16>, vector<2x8x8xf32> -> vector<2x8x8xf32>
    "tpu.trace_stop"() : () -> ()
    %107 = vector.shape_cast %106 : vector<2x8x8xf32> to vector<16x8xf32>
    %108 = arith.truncf %107 : vector<16x8xf32> to vector<16x8xbf16>
    %c0_41 = arith.constant 0 : index
    %c16 = arith.constant 16 : index
    %c0_42 = arith.constant 0 : index
    %109 = vector.load %arg4[%c0_41, %c16, %c0_42] : memref<2x32x32xbf16, #tpu.memory_space<vmem>>, vector<1x8x32xbf16>
    %110 = vector.shape_cast %109 : vector<1x8x32xbf16> to vector<8x32xbf16>
    %cst_43 = arith.constant dense<0.000000e+00> : vector<16x32xf32>
    %111 = tpu.matmul %108, %110, %cst_43 {dimension_numbers = #tpu.dot_dimension_numbers<[1], [0], [0], [1], [0, 0, 1, 1], [], []>} : vector<16x8xbf16>, vector<8x32xbf16>, vector<16x32xf32> -> vector<16x32xf32>
    %112 = arith.addf %102, %111 : vector<16x32xf32>
    %113 = vector.extract_strided_slice %81 {offsets = [3, 0, 0, 0], sizes = [1, 2, 8, 8], strides = [1, 1, 1, 1]} : vector<4x2x8x8xbf16> to vector<1x2x8x8xbf16>
    %114 = vector.shape_cast %113 : vector<1x2x8x8xbf16> to vector<2x8x8xbf16>
    %115 = vector.extract_strided_slice %53 {offsets = [0, 0, 24], sizes = [2, 8, 8], strides = [1, 1, 1]} : vector<2x8x32xbf16> to vector<2x8x8xbf16>
    "tpu.trace_start"() <{level = 10 : i32, message = "bqk,bkd->bqd"}> : () -> ()
    %cst_44 = arith.constant dense<0.000000e+00> : vector<2x8x8xf32>
    %116 = tpu.matmul %114, %115, %cst_44 {dimension_numbers = #tpu.dot_dimension_numbers<[2], [1], [1], [2], [0, 0, 0, 1, 1, 2], [0], [0]>} : vector<2x8x8xbf16>, vector<2x8x8xbf16>, vector<2x8x8xf32> -> vector<2x8x8xf32>
    "tpu.trace_stop"() : () -> ()
    %117 = vector.shape_cast %116 : vector<2x8x8xf32> to vector<16x8xf32>
    %118 = arith.truncf %117 : vector<16x8xf32> to vector<16x8xbf16>
    %c0_45 = arith.constant 0 : index
    %c24 = arith.constant 24 : index
    %c0_46 = arith.constant 0 : index
    %119 = vector.load %arg4[%c0_45, %c24, %c0_46] : memref<2x32x32xbf16, #tpu.memory_space<vmem>>, vector<1x8x32xbf16>
    %120 = vector.shape_cast %119 : vector<1x8x32xbf16> to vector<8x32xbf16>
    %cst_47 = arith.constant dense<0.000000e+00> : vector<16x32xf32>
    %121 = tpu.matmul %118, %120, %cst_47 {dimension_numbers = #tpu.dot_dimension_numbers<[1], [0], [0], [1], [0, 0, 1, 1], [], []>} : vector<16x8xbf16>, vector<8x32xbf16>, vector<16x32xf32> -> vector<16x32xf32>
    %122 = arith.addf %112, %121 : vector<16x32xf32>
    %123 = arith.addf %24, %122 : vector<16x32xf32>
    %124 = vector.broadcast %30 : vector<1x32xf32> to vector<16x32xf32>
    %125 = arith.addf %123, %124 : vector<16x32xf32>
    %cst_48 = arith.constant dense<0.000000e+00> : vector<16xf32>
    %126 = vector.multi_reduction <add>, %125, %cst_48 [1] : vector<16x32xf32> to vector<16xf32>
    %127 = vector.shape_cast %126 : vector<16xf32> to vector<16x1xf32>
    %cst_49 = arith.constant 3.200000e+01 : f32
    %128 = vector.broadcast %cst_49 : f32 to vector<16x1xf32>
    %129 = arith.divf %127, %128 : vector<16x1xf32>
    %130 = vector.broadcast %129 : vector<16x1xf32> to vector<16x32xf32>
    %131 = arith.subf %125, %130 : vector<16x32xf32>
    %132 = arith.mulf %131, %131 : vector<16x32xf32>
    %cst_50 = arith.constant dense<0.000000e+00> : vector<16xf32>
    %133 = vector.multi_reduction <add>, %132, %cst_50 [1] : vector<16x32xf32> to vector<16xf32>
    %134 = vector.shape_cast %133 : vector<16xf32> to vector<16x1xf32>
    %cst_51 = arith.constant 3.200000e+01 : f32
    %135 = vector.broadcast %cst_51 : f32 to vector<16x1xf32>
    %136 = arith.divf %134, %135 : vector<16x1xf32>
    %137 = vector.broadcast %129 : vector<16x1xf32> to vector<16x32xf32>
    %138 = arith.subf %125, %137 : vector<16x32xf32>
    %cst_52 = arith.constant 9.99999996E-13 : f32
    %139 = vector.broadcast %cst_52 : f32 to vector<16x1xf32>
    %140 = arith.addf %136, %139 : vector<16x1xf32>
    %141 = math.rsqrt %140 : vector<16x1xf32>
    %142 = vector.broadcast %141 : vector<16x1xf32> to vector<16x32xf32>
    %143 = arith.mulf %138, %142 : vector<16x32xf32>
    %144 = vector.broadcast %31 : vector<1x32xf32> to vector<16x32xf32>
    %145 = arith.mulf %143, %144 : vector<16x32xf32>
    %146 = vector.broadcast %32 : vector<1x32xf32> to vector<16x32xf32>
    %147 = arith.addf %145, %146 : vector<16x32xf32>
    %148 = arith.truncf %147 : vector<16x32xf32> to vector<16x32xbf16>
    %c0_53 = arith.constant 0 : index
    %c0_54 = arith.constant 0 : index
    %c0_55 = arith.constant 0 : index
    %149 = vector.load %arg5[%c0_53, %c0_54, %c0_55] : memref<2x32x64xbf16, #tpu.memory_space<vmem>>, vector<1x32x64xbf16>
    %150 = vector.shape_cast %149 : vector<1x32x64xbf16> to vector<32x64xbf16>
    %cst_56 = arith.constant dense<0.000000e+00> : vector<16x64xf32>
    %151 = tpu.matmul %148, %150, %cst_56 {dimension_numbers = #tpu.dot_dimension_numbers<[1], [0], [0], [1], [0, 0, 1, 1], [], []>} : vector<16x32xbf16>, vector<32x64xbf16>, vector<16x64xf32> -> vector<16x64xf32>
    %152 = vector.broadcast %33 : vector<1x64xf32> to vector<16x64xf32>
    %153 = arith.addf %151, %152 : vector<16x64xf32>
    %cst_57 = arith.constant 5.000000e-01 : f32
    %154 = vector.broadcast %cst_57 : f32 to vector<16x64xf32>
    %155 = arith.mulf %154, %153 : vector<16x64xf32>
    %cst_58 = arith.constant 4.471500e-02 : f32
    %156 = vector.broadcast %cst_58 : f32 to vector<16x64xf32>
    %157 = arith.mulf %156, %153 : vector<16x64xf32>
    %158 = arith.mulf %157, %153 : vector<16x64xf32>
    %159 = arith.mulf %158, %153 : vector<16x64xf32>
    %160 = arith.addf %153, %159 : vector<16x64xf32>
    %cst_59 = arith.constant 0.797884583 : f32
    %161 = vector.broadcast %cst_59 : f32 to vector<16x64xf32>
    %162 = arith.mulf %161, %160 : vector<16x64xf32>
    %163 = math.tanh %162 : vector<16x64xf32>
    %cst_60 = arith.constant 1.000000e+00 : f32
    %164 = vector.broadcast %cst_60 : f32 to vector<16x64xf32>
    %165 = arith.addf %164, %163 : vector<16x64xf32>
    %166 = arith.mulf %155, %165 : vector<16x64xf32>
    %167 = arith.truncf %166 : vector<16x64xf32> to vector<16x64xbf16>
    %c0_61 = arith.constant 0 : index
    %c0_62 = arith.constant 0 : index
    %c0_63 = arith.constant 0 : index
    %168 = vector.load %arg6[%c0_61, %c0_62, %c0_63] : memref<2x64x32xbf16, #tpu.memory_space<vmem>>, vector<1x64x32xbf16>
    %169 = vector.shape_cast %168 : vector<1x64x32xbf16> to vector<64x32xbf16>
    %cst_64 = arith.constant dense<0.000000e+00> : vector<16x32xf32>
    %170 = tpu.matmul %167, %169, %cst_64 {dimension_numbers = #tpu.dot_dimension_numbers<[1], [0], [0], [1], [0, 0, 1, 1], [], []>} : vector<16x64xbf16>, vector<64x32xbf16>, vector<16x32xf32> -> vector<16x32xf32>
    %171 = vector.broadcast %34 : vector<1x32xf32> to vector<16x32xf32>
    %172 = arith.addf %170, %171 : vector<16x32xf32>
    %173 = arith.addf %147, %172 : vector<16x32xf32>
    %cst_65 = arith.constant dense<0.000000e+00> : vector<16xf32>
    %174 = vector.multi_reduction <add>, %173, %cst_65 [1] : vector<16x32xf32> to vector<16xf32>
    %175 = vector.shape_cast %174 : vector<16xf32> to vector<16x1xf32>
    %cst_66 = arith.constant 3.200000e+01 : f32
    %176 = vector.broadcast %cst_66 : f32 to vector<16x1xf32>
    %177 = arith.divf %175, %176 : vector<16x1xf32>
    %178 = vector.broadcast %177 : vector<16x1xf32> to vector<16x32xf32>
    %179 = arith.subf %173, %178 : vector<16x32xf32>
    %180 = arith.mulf %179, %179 : vector<16x32xf32>
    %cst_67 = arith.constant dense<0.000000e+00> : vector<16xf32>
    %181 = vector.multi_reduction <add>, %180, %cst_67 [1] : vector<16x32xf32> to vector<16xf32>
    %182 = vector.shape_cast %181 : vector<16xf32> to vector<16x1xf32>
    %cst_68 = arith.constant 3.200000e+01 : f32
    %183 = vector.broadcast %cst_68 : f32 to vector<16x1xf32>
    %184 = arith.divf %182, %183 : vector<16x1xf32>
    %185 = vector.broadcast %177 : vector<16x1xf32> to vector<16x32xf32>
    %186 = arith.subf %173, %185 : vector<16x32xf32>
    %cst_69 = arith.constant 9.99999996E-13 : f32
    %187 = vector.broadcast %cst_69 : f32 to vector<16x1xf32>
    %188 = arith.addf %184, %187 : vector<16x1xf32>
    %189 = math.rsqrt %188 : vector<16x1xf32>
    %190 = vector.broadcast %189 : vector<16x1xf32> to vector<16x32xf32>
    %191 = arith.mulf %186, %190 : vector<16x32xf32>
    %192 = vector.broadcast %35 : vector<1x32xf32> to vector<16x32xf32>
    %193 = arith.mulf %191, %192 : vector<16x32xf32>
    %194 = vector.broadcast %36 : vector<1x32xf32> to vector<16x32xf32>
    %195 = arith.addf %193, %194 : vector<16x32xf32>
    %c10 = arith.constant 10 : index
    %c0_70 = arith.constant 0 : index
    %196 = vector.load %arg2[%c10, %c0_70] : memref<18x128xf32, #tpu.memory_space<vmem>>, vector<1x96xf32>
    %c11 = arith.constant 11 : index
    %c0_71 = arith.constant 0 : index
    %197 = vector.load %arg2[%c11, %c0_71] : memref<18x128xf32, #tpu.memory_space<vmem>>, vector<1x32xf32>
    %c12 = arith.constant 12 : index
    %c0_72 = arith.constant 0 : index
    %198 = vector.load %arg2[%c12, %c0_72] : memref<18x128xf32, #tpu.memory_space<vmem>>, vector<1x32xf32>
    %c13 = arith.constant 13 : index
    %c0_73 = arith.constant 0 : index
    %199 = vector.load %arg2[%c13, %c0_73] : memref<18x128xf32, #tpu.memory_space<vmem>>, vector<1x32xf32>
    %c14 = arith.constant 14 : index
    %c0_74 = arith.constant 0 : index
    %200 = vector.load %arg2[%c14, %c0_74] : memref<18x128xf32, #tpu.memory_space<vmem>>, vector<1x64xf32>
    %c15 = arith.constant 15 : index
    %c0_75 = arith.constant 0 : index
    %201 = vector.load %arg2[%c15, %c0_75] : memref<18x128xf32, #tpu.memory_space<vmem>>, vector<1x32xf32>
    %c16_76 = arith.constant 16 : index
    %c0_77 = arith.constant 0 : index
    %202 = vector.load %arg2[%c16_76, %c0_77] : memref<18x128xf32, #tpu.memory_space<vmem>>, vector<1x32xf32>
    %c17 = arith.constant 17 : index
    %c0_78 = arith.constant 0 : index
    %203 = vector.load %arg2[%c17, %c0_78] : memref<18x128xf32, #tpu.memory_space<vmem>>, vector<1x32xf32>
    %204 = arith.truncf %195 : vector<16x32xf32> to vector<16x32xbf16>
    %c1_79 = arith.constant 1 : index
    %c0_80 = arith.constant 0 : index
    %c0_81 = arith.constant 0 : index
    %205 = vector.load %arg3[%c1_79, %c0_80, %c0_81] : memref<2x32x96xbf16, #tpu.memory_space<vmem>>, vector<1x32x96xbf16>
    %206 = vector.shape_cast %205 : vector<1x32x96xbf16> to vector<32x96xbf16>
    %cst_82 = arith.constant dense<0.000000e+00> : vector<16x96xf32>
    %207 = tpu.matmul %204, %206, %cst_82 {dimension_numbers = #tpu.dot_dimension_numbers<[1], [0], [0], [1], [0, 0, 1, 1], [], []>} : vector<16x32xbf16>, vector<32x96xbf16>, vector<16x96xf32> -> vector<16x96xf32>
    %208 = vector.broadcast %196 : vector<1x96xf32> to vector<16x96xf32>
    %209 = arith.addf %207, %208 : vector<16x96xf32>
    %210 = vector.extract_strided_slice %209 {offsets = [0, 0], sizes = [16, 32], strides = [1, 1]} : vector<16x96xf32> to vector<16x32xf32>
    %cst_83 = arith.constant 0.353553385 : f32
    %211 = vector.broadcast %cst_83 : f32 to vector<16x32xf32>
    %212 = arith.mulf %210, %211 : vector<16x32xf32>
    %213 = vector.shape_cast %212 : vector<16x32xf32> to vector<2x8x32xf32>
    %214 = vector.extract_strided_slice %209 {offsets = [0, 32], sizes = [16, 32], strides = [1, 1]} : vector<16x96xf32> to vector<16x32xf32>
    %215 = vector.shape_cast %214 : vector<16x32xf32> to vector<2x8x32xf32>
    %216 = vector.extract_strided_slice %209 {offsets = [0, 64], sizes = [16, 32], strides = [1, 1]} : vector<16x96xf32> to vector<16x32xf32>
    %217 = vector.shape_cast %216 : vector<16x32xf32> to vector<2x8x32xf32>
    %218 = arith.truncf %213 : vector<2x8x32xf32> to vector<2x8x32xbf16>
    %219 = arith.truncf %215 : vector<2x8x32xf32> to vector<2x8x32xbf16>
    %220 = arith.truncf %217 : vector<2x8x32xf32> to vector<2x8x32xbf16>
    %221 = vector.extract_strided_slice %218 {offsets = [0, 0, 0], sizes = [2, 8, 8], strides = [1, 1, 1]} : vector<2x8x32xbf16> to vector<2x8x8xbf16>
    %222 = vector.extract_strided_slice %219 {offsets = [0, 0, 0], sizes = [2, 8, 8], strides = [1, 1, 1]} : vector<2x8x32xbf16> to vector<2x8x8xbf16>
    "tpu.trace_start"() <{level = 10 : i32, message = "bqd,bkd->bqk"}> : () -> ()
    %cst_84 = arith.constant dense<0.000000e+00> : vector<2x8x8xf32>
    %223 = tpu.matmul %221, %222, %cst_84 {dimension_numbers = #tpu.dot_dimension_numbers<[2], [2], [1], [1], [0, 0, 0, 1, 1, 1], [0], [0]>} : vector<2x8x8xbf16>, vector<2x8x8xbf16>, vector<2x8x8xf32> -> vector<2x8x8xf32>
    "tpu.trace_stop"() : () -> ()
    %224 = vector.extract_strided_slice %218 {offsets = [0, 0, 8], sizes = [2, 8, 8], strides = [1, 1, 1]} : vector<2x8x32xbf16> to vector<2x8x8xbf16>
    %225 = vector.extract_strided_slice %219 {offsets = [0, 0, 8], sizes = [2, 8, 8], strides = [1, 1, 1]} : vector<2x8x32xbf16> to vector<2x8x8xbf16>
    "tpu.trace_start"() <{level = 10 : i32, message = "bqd,bkd->bqk"}> : () -> ()
    %cst_85 = arith.constant dense<0.000000e+00> : vector<2x8x8xf32>
    %226 = tpu.matmul %224, %225, %cst_85 {dimension_numbers = #tpu.dot_dimension_numbers<[2], [2], [1], [1], [0, 0, 0, 1, 1, 1], [0], [0]>} : vector<2x8x8xbf16>, vector<2x8x8xbf16>, vector<2x8x8xf32> -> vector<2x8x8xf32>
    "tpu.trace_stop"() : () -> ()
    %227 = vector.extract_strided_slice %218 {offsets = [0, 0, 16], sizes = [2, 8, 8], strides = [1, 1, 1]} : vector<2x8x32xbf16> to vector<2x8x8xbf16>
    %228 = vector.extract_strided_slice %219 {offsets = [0, 0, 16], sizes = [2, 8, 8], strides = [1, 1, 1]} : vector<2x8x32xbf16> to vector<2x8x8xbf16>
    "tpu.trace_start"() <{level = 10 : i32, message = "bqd,bkd->bqk"}> : () -> ()
    %cst_86 = arith.constant dense<0.000000e+00> : vector<2x8x8xf32>
    %229 = tpu.matmul %227, %228, %cst_86 {dimension_numbers = #tpu.dot_dimension_numbers<[2], [2], [1], [1], [0, 0, 0, 1, 1, 1], [0], [0]>} : vector<2x8x8xbf16>, vector<2x8x8xbf16>, vector<2x8x8xf32> -> vector<2x8x8xf32>
    "tpu.trace_stop"() : () -> ()
    %230 = vector.extract_strided_slice %218 {offsets = [0, 0, 24], sizes = [2, 8, 8], strides = [1, 1, 1]} : vector<2x8x32xbf16> to vector<2x8x8xbf16>
    %231 = vector.extract_strided_slice %219 {offsets = [0, 0, 24], sizes = [2, 8, 8], strides = [1, 1, 1]} : vector<2x8x32xbf16> to vector<2x8x8xbf16>
    "tpu.trace_start"() <{level = 10 : i32, message = "bqd,bkd->bqk"}> : () -> ()
    %cst_87 = arith.constant dense<0.000000e+00> : vector<2x8x8xf32>
    %232 = tpu.matmul %230, %231, %cst_87 {dimension_numbers = #tpu.dot_dimension_numbers<[2], [2], [1], [1], [0, 0, 0, 1, 1, 1], [0], [0]>} : vector<2x8x8xbf16>, vector<2x8x8xbf16>, vector<2x8x8xf32> -> vector<2x8x8xf32>
    "tpu.trace_stop"() : () -> ()
    %233 = vector.shape_cast %223 : vector<2x8x8xf32> to vector<1x2x8x8xf32>
    %234 = vector.shape_cast %226 : vector<2x8x8xf32> to vector<1x2x8x8xf32>
    %235 = vector.shape_cast %229 : vector<2x8x8xf32> to vector<1x2x8x8xf32>
    %236 = vector.shape_cast %232 : vector<2x8x8xf32> to vector<1x2x8x8xf32>
    %237 = tpu.concatenate %233, %234, %235, %236 in 0 : vector<1x2x8x8xf32>, vector<1x2x8x8xf32>, vector<1x2x8x8xf32>, vector<1x2x8x8xf32> -> vector<4x2x8x8xf32>
    %238 = arith.addf %237, %28 : vector<4x2x8x8xf32>
    %cst_88 = arith.constant dense<0xFF800000> : vector<4x2x8xf32>
    %239 = vector.multi_reduction <maximumf>, %238, %cst_88 [3] : vector<4x2x8x8xf32> to vector<4x2x8xf32>
    %240 = vector.shape_cast %239 : vector<4x2x8xf32> to vector<4x2x8x1xf32>
    %241 = vector.broadcast %240 : vector<4x2x8x1xf32> to vector<4x2x8x8xf32>
    %242 = arith.subf %238, %241 : vector<4x2x8x8xf32>
    %243 = math.exp %242 : vector<4x2x8x8xf32>
    %cst_89 = arith.constant dense<0.000000e+00> : vector<4x2x8xf32>
    %244 = vector.multi_reduction <add>, %243, %cst_89 [3] : vector<4x2x8x8xf32> to vector<4x2x8xf32>
    %245 = vector.shape_cast %244 : vector<4x2x8xf32> to vector<4x2x8x1xf32>
    %246 = vector.broadcast %245 : vector<4x2x8x1xf32> to vector<4x2x8x8xf32>
    %247 = arith.divf %243, %246 : vector<4x2x8x8xf32>
    %248 = arith.truncf %247 : vector<4x2x8x8xf32> to vector<4x2x8x8xbf16>
    %cst_90 = arith.constant 0.000000e+00 : f32
    %249 = vector.broadcast %cst_90 : f32 to vector<16x32xf32>
    %250 = vector.extract_strided_slice %248 {offsets = [0, 0, 0, 0], sizes = [1, 2, 8, 8], strides = [1, 1, 1, 1]} : vector<4x2x8x8xbf16> to vector<1x2x8x8xbf16>
    %251 = vector.shape_cast %250 : vector<1x2x8x8xbf16> to vector<2x8x8xbf16>
    %252 = vector.extract_strided_slice %220 {offsets = [0, 0, 0], sizes = [2, 8, 8], strides = [1, 1, 1]} : vector<2x8x32xbf16> to vector<2x8x8xbf16>
    "tpu.trace_start"() <{level = 10 : i32, message = "bqk,bkd->bqd"}> : () -> ()
    %cst_91 = arith.constant dense<0.000000e+00> : vector<2x8x8xf32>
    %253 = tpu.matmul %251, %252, %cst_91 {dimension_numbers = #tpu.dot_dimension_numbers<[2], [1], [1], [2], [0, 0, 0, 1, 1, 2], [0], [0]>} : vector<2x8x8xbf16>, vector<2x8x8xbf16>, vector<2x8x8xf32> -> vector<2x8x8xf32>
    "tpu.trace_stop"() : () -> ()
    %254 = vector.shape_cast %253 : vector<2x8x8xf32> to vector<16x8xf32>
    %255 = arith.truncf %254 : vector<16x8xf32> to vector<16x8xbf16>
    %c1_92 = arith.constant 1 : index
    %c0_93 = arith.constant 0 : index
    %c0_94 = arith.constant 0 : index
    %256 = vector.load %arg4[%c1_92, %c0_93, %c0_94] : memref<2x32x32xbf16, #tpu.memory_space<vmem>>, vector<1x8x32xbf16>
    %257 = vector.shape_cast %256 : vector<1x8x32xbf16> to vector<8x32xbf16>
    %cst_95 = arith.constant dense<0.000000e+00> : vector<16x32xf32>
    %258 = tpu.matmul %255, %257, %cst_95 {dimension_numbers = #tpu.dot_dimension_numbers<[1], [0], [0], [1], [0, 0, 1, 1], [], []>} : vector<16x8xbf16>, vector<8x32xbf16>, vector<16x32xf32> -> vector<16x32xf32>
    %259 = arith.addf %249, %258 : vector<16x32xf32>
    %260 = vector.extract_strided_slice %248 {offsets = [1, 0, 0, 0], sizes = [1, 2, 8, 8], strides = [1, 1, 1, 1]} : vector<4x2x8x8xbf16> to vector<1x2x8x8xbf16>
    %261 = vector.shape_cast %260 : vector<1x2x8x8xbf16> to vector<2x8x8xbf16>
    %262 = vector.extract_strided_slice %220 {offsets = [0, 0, 8], sizes = [2, 8, 8], strides = [1, 1, 1]} : vector<2x8x32xbf16> to vector<2x8x8xbf16>
    "tpu.trace_start"() <{level = 10 : i32, message = "bqk,bkd->bqd"}> : () -> ()
    %cst_96 = arith.constant dense<0.000000e+00> : vector<2x8x8xf32>
    %263 = tpu.matmul %261, %262, %cst_96 {dimension_numbers = #tpu.dot_dimension_numbers<[2], [1], [1], [2], [0, 0, 0, 1, 1, 2], [0], [0]>} : vector<2x8x8xbf16>, vector<2x8x8xbf16>, vector<2x8x8xf32> -> vector<2x8x8xf32>
    "tpu.trace_stop"() : () -> ()
    %264 = vector.shape_cast %263 : vector<2x8x8xf32> to vector<16x8xf32>
    %265 = arith.truncf %264 : vector<16x8xf32> to vector<16x8xbf16>
    %c1_97 = arith.constant 1 : index
    %c8_98 = arith.constant 8 : index
    %c0_99 = arith.constant 0 : index
    %266 = vector.load %arg4[%c1_97, %c8_98, %c0_99] : memref<2x32x32xbf16, #tpu.memory_space<vmem>>, vector<1x8x32xbf16>
    %267 = vector.shape_cast %266 : vector<1x8x32xbf16> to vector<8x32xbf16>
    %cst_100 = arith.constant dense<0.000000e+00> : vector<16x32xf32>
    %268 = tpu.matmul %265, %267, %cst_100 {dimension_numbers = #tpu.dot_dimension_numbers<[1], [0], [0], [1], [0, 0, 1, 1], [], []>} : vector<16x8xbf16>, vector<8x32xbf16>, vector<16x32xf32> -> vector<16x32xf32>
    %269 = arith.addf %259, %268 : vector<16x32xf32>
    %270 = vector.extract_strided_slice %248 {offsets = [2, 0, 0, 0], sizes = [1, 2, 8, 8], strides = [1, 1, 1, 1]} : vector<4x2x8x8xbf16> to vector<1x2x8x8xbf16>
    %271 = vector.shape_cast %270 : vector<1x2x8x8xbf16> to vector<2x8x8xbf16>
    %272 = vector.extract_strided_slice %220 {offsets = [0, 0, 16], sizes = [2, 8, 8], strides = [1, 1, 1]} : vector<2x8x32xbf16> to vector<2x8x8xbf16>
    "tpu.trace_start"() <{level = 10 : i32, message = "bqk,bkd->bqd"}> : () -> ()
    %cst_101 = arith.constant dense<0.000000e+00> : vector<2x8x8xf32>
    %273 = tpu.matmul %271, %272, %cst_101 {dimension_numbers = #tpu.dot_dimension_numbers<[2], [1], [1], [2], [0, 0, 0, 1, 1, 2], [0], [0]>} : vector<2x8x8xbf16>, vector<2x8x8xbf16>, vector<2x8x8xf32> -> vector<2x8x8xf32>
    "tpu.trace_stop"() : () -> ()
    %274 = vector.shape_cast %273 : vector<2x8x8xf32> to vector<16x8xf32>
    %275 = arith.truncf %274 : vector<16x8xf32> to vector<16x8xbf16>
    %c1_102 = arith.constant 1 : index
    %c16_103 = arith.constant 16 : index
    %c0_104 = arith.constant 0 : index
    %276 = vector.load %arg4[%c1_102, %c16_103, %c0_104] : memref<2x32x32xbf16, #tpu.memory_space<vmem>>, vector<1x8x32xbf16>
    %277 = vector.shape_cast %276 : vector<1x8x32xbf16> to vector<8x32xbf16>
    %cst_105 = arith.constant dense<0.000000e+00> : vector<16x32xf32>
    %278 = tpu.matmul %275, %277, %cst_105 {dimension_numbers = #tpu.dot_dimension_numbers<[1], [0], [0], [1], [0, 0, 1, 1], [], []>} : vector<16x8xbf16>, vector<8x32xbf16>, vector<16x32xf32> -> vector<16x32xf32>
    %279 = arith.addf %269, %278 : vector<16x32xf32>
    %280 = vector.extract_strided_slice %248 {offsets = [3, 0, 0, 0], sizes = [1, 2, 8, 8], strides = [1, 1, 1, 1]} : vector<4x2x8x8xbf16> to vector<1x2x8x8xbf16>
    %281 = vector.shape_cast %280 : vector<1x2x8x8xbf16> to vector<2x8x8xbf16>
    %282 = vector.extract_strided_slice %220 {offsets = [0, 0, 24], sizes = [2, 8, 8], strides = [1, 1, 1]} : vector<2x8x32xbf16> to vector<2x8x8xbf16>
    "tpu.trace_start"() <{level = 10 : i32, message = "bqk,bkd->bqd"}> : () -> ()
    %cst_106 = arith.constant dense<0.000000e+00> : vector<2x8x8xf32>
    %283 = tpu.matmul %281, %282, %cst_106 {dimension_numbers = #tpu.dot_dimension_numbers<[2], [1], [1], [2], [0, 0, 0, 1, 1, 2], [0], [0]>} : vector<2x8x8xbf16>, vector<2x8x8xbf16>, vector<2x8x8xf32> -> vector<2x8x8xf32>
    "tpu.trace_stop"() : () -> ()
    %284 = vector.shape_cast %283 : vector<2x8x8xf32> to vector<16x8xf32>
    %285 = arith.truncf %284 : vector<16x8xf32> to vector<16x8xbf16>
    %c1_107 = arith.constant 1 : index
    %c24_108 = arith.constant 24 : index
    %c0_109 = arith.constant 0 : index
    %286 = vector.load %arg4[%c1_107, %c24_108, %c0_109] : memref<2x32x32xbf16, #tpu.memory_space<vmem>>, vector<1x8x32xbf16>
    %287 = vector.shape_cast %286 : vector<1x8x32xbf16> to vector<8x32xbf16>
    %cst_110 = arith.constant dense<0.000000e+00> : vector<16x32xf32>
    %288 = tpu.matmul %285, %287, %cst_110 {dimension_numbers = #tpu.dot_dimension_numbers<[1], [0], [0], [1], [0, 0, 1, 1], [], []>} : vector<16x8xbf16>, vector<8x32xbf16>, vector<16x32xf32> -> vector<16x32xf32>
    %289 = arith.addf %279, %288 : vector<16x32xf32>
    %290 = arith.addf %195, %289 : vector<16x32xf32>
    %291 = vector.broadcast %197 : vector<1x32xf32> to vector<16x32xf32>
    %292 = arith.addf %290, %291 : vector<16x32xf32>
    %cst_111 = arith.constant dense<0.000000e+00> : vector<16xf32>
    %293 = vector.multi_reduction <add>, %292, %cst_111 [1] : vector<16x32xf32> to vector<16xf32>
    %294 = vector.shape_cast %293 : vector<16xf32> to vector<16x1xf32>
    %cst_112 = arith.constant 3.200000e+01 : f32
    %295 = vector.broadcast %cst_112 : f32 to vector<16x1xf32>
    %296 = arith.divf %294, %295 : vector<16x1xf32>
    %297 = vector.broadcast %296 : vector<16x1xf32> to vector<16x32xf32>
    %298 = arith.subf %292, %297 : vector<16x32xf32>
    %299 = arith.mulf %298, %298 : vector<16x32xf32>
    %cst_113 = arith.constant dense<0.000000e+00> : vector<16xf32>
    %300 = vector.multi_reduction <add>, %299, %cst_113 [1] : vector<16x32xf32> to vector<16xf32>
    %301 = vector.shape_cast %300 : vector<16xf32> to vector<16x1xf32>
    %cst_114 = arith.constant 3.200000e+01 : f32
    %302 = vector.broadcast %cst_114 : f32 to vector<16x1xf32>
    %303 = arith.divf %301, %302 : vector<16x1xf32>
    %304 = vector.broadcast %296 : vector<16x1xf32> to vector<16x32xf32>
    %305 = arith.subf %292, %304 : vector<16x32xf32>
    %cst_115 = arith.constant 9.99999996E-13 : f32
    %306 = vector.broadcast %cst_115 : f32 to vector<16x1xf32>
    %307 = arith.addf %303, %306 : vector<16x1xf32>
    %308 = math.rsqrt %307 : vector<16x1xf32>
    %309 = vector.broadcast %308 : vector<16x1xf32> to vector<16x32xf32>
    %310 = arith.mulf %305, %309 : vector<16x32xf32>
    %311 = vector.broadcast %198 : vector<1x32xf32> to vector<16x32xf32>
    %312 = arith.mulf %310, %311 : vector<16x32xf32>
    %313 = vector.broadcast %199 : vector<1x32xf32> to vector<16x32xf32>
    %314 = arith.addf %312, %313 : vector<16x32xf32>
    %315 = arith.truncf %314 : vector<16x32xf32> to vector<16x32xbf16>
    %c1_116 = arith.constant 1 : index
    %c0_117 = arith.constant 0 : index
    %c0_118 = arith.constant 0 : index
    %316 = vector.load %arg5[%c1_116, %c0_117, %c0_118] : memref<2x32x64xbf16, #tpu.memory_space<vmem>>, vector<1x32x64xbf16>
    %317 = vector.shape_cast %316 : vector<1x32x64xbf16> to vector<32x64xbf16>
    %cst_119 = arith.constant dense<0.000000e+00> : vector<16x64xf32>
    %318 = tpu.matmul %315, %317, %cst_119 {dimension_numbers = #tpu.dot_dimension_numbers<[1], [0], [0], [1], [0, 0, 1, 1], [], []>} : vector<16x32xbf16>, vector<32x64xbf16>, vector<16x64xf32> -> vector<16x64xf32>
    %319 = vector.broadcast %200 : vector<1x64xf32> to vector<16x64xf32>
    %320 = arith.addf %318, %319 : vector<16x64xf32>
    %cst_120 = arith.constant 5.000000e-01 : f32
    %321 = vector.broadcast %cst_120 : f32 to vector<16x64xf32>
    %322 = arith.mulf %321, %320 : vector<16x64xf32>
    %cst_121 = arith.constant 4.471500e-02 : f32
    %323 = vector.broadcast %cst_121 : f32 to vector<16x64xf32>
    %324 = arith.mulf %323, %320 : vector<16x64xf32>
    %325 = arith.mulf %324, %320 : vector<16x64xf32>
    %326 = arith.mulf %325, %320 : vector<16x64xf32>
    %327 = arith.addf %320, %326 : vector<16x64xf32>
    %cst_122 = arith.constant 0.797884583 : f32
    %328 = vector.broadcast %cst_122 : f32 to vector<16x64xf32>
    %329 = arith.mulf %328, %327 : vector<16x64xf32>
    %330 = math.tanh %329 : vector<16x64xf32>
    %cst_123 = arith.constant 1.000000e+00 : f32
    %331 = vector.broadcast %cst_123 : f32 to vector<16x64xf32>
    %332 = arith.addf %331, %330 : vector<16x64xf32>
    %333 = arith.mulf %322, %332 : vector<16x64xf32>
    %334 = arith.truncf %333 : vector<16x64xf32> to vector<16x64xbf16>
    %c1_124 = arith.constant 1 : index
    %c0_125 = arith.constant 0 : index
    %c0_126 = arith.constant 0 : index
    %335 = vector.load %arg6[%c1_124, %c0_125, %c0_126] : memref<2x64x32xbf16, #tpu.memory_space<vmem>>, vector<1x64x32xbf16>
    %336 = vector.shape_cast %335 : vector<1x64x32xbf16> to vector<64x32xbf16>
    %cst_127 = arith.constant dense<0.000000e+00> : vector<16x32xf32>
    %337 = tpu.matmul %334, %336, %cst_127 {dimension_numbers = #tpu.dot_dimension_numbers<[1], [0], [0], [1], [0, 0, 1, 1], [], []>} : vector<16x64xbf16>, vector<64x32xbf16>, vector<16x32xf32> -> vector<16x32xf32>
    %338 = vector.broadcast %201 : vector<1x32xf32> to vector<16x32xf32>
    %339 = arith.addf %337, %338 : vector<16x32xf32>
    %340 = arith.addf %314, %339 : vector<16x32xf32>
    %cst_128 = arith.constant dense<0.000000e+00> : vector<16xf32>
    %341 = vector.multi_reduction <add>, %340, %cst_128 [1] : vector<16x32xf32> to vector<16xf32>
    %342 = vector.shape_cast %341 : vector<16xf32> to vector<16x1xf32>
    %cst_129 = arith.constant 3.200000e+01 : f32
    %343 = vector.broadcast %cst_129 : f32 to vector<16x1xf32>
    %344 = arith.divf %342, %343 : vector<16x1xf32>
    %345 = vector.broadcast %344 : vector<16x1xf32> to vector<16x32xf32>
    %346 = arith.subf %340, %345 : vector<16x32xf32>
    %347 = arith.mulf %346, %346 : vector<16x32xf32>
    %cst_130 = arith.constant dense<0.000000e+00> : vector<16xf32>
    %348 = vector.multi_reduction <add>, %347, %cst_130 [1] : vector<16x32xf32> to vector<16xf32>
    %349 = vector.shape_cast %348 : vector<16xf32> to vector<16x1xf32>
    %cst_131 = arith.constant 3.200000e+01 : f32
    %350 = vector.broadcast %cst_131 : f32 to vector<16x1xf32>
    %351 = arith.divf %349, %350 : vector<16x1xf32>
    %352 = vector.broadcast %344 : vector<16x1xf32> to vector<16x32xf32>
    %353 = arith.subf %340, %352 : vector<16x32xf32>
    %cst_132 = arith.constant 9.99999996E-13 : f32
    %354 = vector.broadcast %cst_132 : f32 to vector<16x1xf32>
    %355 = arith.addf %351, %354 : vector<16x1xf32>
    %356 = math.rsqrt %355 : vector<16x1xf32>
    %357 = vector.broadcast %356 : vector<16x1xf32> to vector<16x32xf32>
    %358 = arith.mulf %353, %357 : vector<16x32xf32>
    %359 = vector.broadcast %202 : vector<1x32xf32> to vector<16x32xf32>
    %360 = arith.mulf %358, %359 : vector<16x32xf32>
    %361 = vector.broadcast %203 : vector<1x32xf32> to vector<16x32xf32>
    %362 = arith.addf %360, %361 : vector<16x32xf32>
    %c0_133 = arith.constant 0 : index
    %c0_134 = arith.constant 0 : index
    %363 = vector.load %arg7[%c0_133, %c0_134] : memref<16x32xf32, #tpu.memory_space<vmem>>, vector<16x32xf32>
    tpu.vector_store %arg7[%c0_133, %c0_134], %362 {strides = array<i32>} : memref<16x32xf32, #tpu.memory_space<vmem>>, vector<16x32xf32>,
    return
  }
}

</mosaic_0001>

<bundles_post_ra>
// kernel: text_encoder_forward.1
= control target key start
LH: loop header
LB: loop body
LE: loop exit
PB: predicated region body
PF: predicated region fallthrough
CT: control target
= control target key end

     0   :  { %vm31_vm0 = vcmask 261120   ;;  %v3573_v15 = vmov 0.0   ;;  %vm3574_vm1 = vmmov 0   ;;  %s3575_s14 = smov 96   ;;  %s3576_s15 = smov 120   ;;  %vm187_vm2 = vcmask 64512   ;;  %s4220_s0 = inlined_call_operand.vmem [shape: f32[16,32], index: 0, kind: input, shape index: {}]   ;;  %s4221_s3 = inlined_call_operand.vmem [shape: bf16[2,32,96], index: 3, kind: input, shape index: {}]   ;;  %s4222_s2 = inlined_call_operand.vmem [shape: f32[18,128], index: 2, kind: input, shape index: {}]   ;;  %s4223_s1 = inlined_call_operand.vmem [shape: f32[2,8], index: 1, kind: input, shape index: {}]   ;;  %s4224_s4 = inlined_call_operand.vmem [shape: bf16[2,32,32], index: 4, kind: input, shape index: {}]   ;;  %s4225_s5 = inlined_call_operand.vmem [shape: bf16[2,32,64], index: 5, kind: input, shape index: {}]   ;;  %s4226_s6 = inlined_call_operand.vmem [shape: bf16[2,64,32], index: 6, kind: input, shape index: {}]   ;;  %s4227_s7 = inlined_call_operand.vmem [shape: f32[16,32], index: 7, kind: output, shape index: {}]  }
   0x1   :  { %v27_v0 = vld [vmem:[%s4220_s0] sm:$0xff]  ;;  %v28_v1 = vld [vmem:[%s4220_s0 + $0x8] sm:$0xff]  ;;  %3155 = vmatprep.subr.bf16.mxu1 %v3573_v15  ;;  %3169 = vmatprep.subr.bf16.mxu0 %v3573_v15  ;;  %s3577_s16 = smov 88   ;;  %s3578_s17 = smov 80   ;;  %v3580_v63 = vmov 1966171168  }
   0x2   :  { %v32_v2 = vsel %vm31_vm0, %v27_v0, 0.0  ;;  %v35_v3 = vsel %vm31_vm0, %v28_v1, 0.0  ;;  %v3465_v14 = vld [vmem:[%s4221_s3] sm:$0xff]   ;;  %v3466_v16 = vld [vmem:[%s4221_s3 + $0x8] sm:$0xff]   ;;  %3159 = vmatprep.mubr.msk.bf16.mxu1 %vm3574_vm1, %v3573_v15  ;;  %3171 = vmatprep.mubr.msk.bf16.mxu0 %vm3574_vm1, %v3573_v15  ;;  %s3579_s18 = smov 112   ;;  %s3582_s21 = smov 104  }
   0x3   :  { %33 = vadd.xlane.f32.xlu0 %v32_v2  ;;  %3156 = vmatpush3.bf16.msra.mxu1 %v3465_v14  ;;  %v2952_v25 = vld [vmem:[%s4222_s2] ss:$0 sm:$0xff]  ;;  %v2953_v29 = vld [vmem:[%s4222_s2 + $0x1] ss:$0 sm:$0xff]  ;;  %v2955_v34 = vld [vmem:[%s4222_s2 + $0x2] ss:$0 sm:$0xff] }
   0x4   :  { %3157 = vmatprep.subr.bf16.mxu1 %v3573_v15  ;;  %s3583_s22 = smov 64   ;;  %vm694_vm3 = vcmask 1043456   ;;  %s3584_s23 = smov 56   ;;  %vm1440_vm4 = vcmask 523264  }
   0x5   :  { %s3585_s24 = smov 48   ;;  %s3586_s28 = smov 40  }
   0x7   :  { %36 = vadd.xlane.f32.xlu0 %v35_v3  ;;  %3158 = vmatpush3.bf16.msra.mxu1 %v3466_v16 }
   0x8   :  { %3163 = vmatprep.subr.bf16.mxu1 %v3573_v15 }
  0x90   :  { %v34_v4 = vpop.xlane.xlu0 %33 }
  0x91   :  { %v39_v5 = vmul.f32 0.03125, %v34_v4  ;;  %v2954_v4 = vld.sshfl [vmem:[%s4223_s1] sm:$0x11 pattern:$0x75316420]  ;;  %s3581_s1 = smov 72  }
  0x93   :  { %v41_v6 = vsub.f32 %v27_v0, %v39_v5  ;;  %v82_v0 = vunpack.c.l.s4 %v3580_v63 }
  0x94   :  { %v37_v7 = vpop.xlane.xlu0 %36 }
  0x95   :  { %v40_v8 = vmul.f32 0.03125, %v37_v7  ;;  %v43_v9 = vmul.f32 %v41_v6, %v41_v6  ;;  %v83_v2 = vunpack.c.0.s8 %v82_v0 }
  0x97   :  { %v42_v10 = vsub.f32 %v28_v1, %v40_v8  ;;  %v45_v11 = vsel %vm31_vm0, %v43_v9, 0.0  ;;  %v84_v1 = vlaneseq }
  0x98   :  { %46 = vadd.xlane.f32.xlu1 %v45_v11 }
  0x99   :  { %v44_v12 = vmul.f32 %v42_v10, %v42_v10  ;;  %v85_v3 = vshrl.u32 %v84_v1, 7 }
  0x9b   :  { %v48_v13 = vsel %vm31_vm0, %v44_v12, 0.0  ;;  %v86_v5 = vsub.s32 %v83_v2, %v85_v3  ;;  %v97_v8 = vsub.s32 0, %v85_v3 }
  0x9c   :  { %49 = vadd.xlane.f32.xlu1 %v48_v13 }
  0x9d   :  { %v87_v7 = vrot.slane %v2954_v4, %v86_v5 }
 0x125   :  { %v47_v17 = vpop.xlane.xlu1 %46 }
 0x126   :  { %v51_v18 = vmul.f32 0.03125, %v47_v17 }
 0x128   :  { %v53_v19 = vadd.f32 1e-12, %v51_v18 }
 0x129   :  { %v50_v20 = vpop.xlane.xlu1 %49 }
 0x12a   :  { %3481 = vrsqrt.f32 %v53_v19  ;;  %v52_v21 = vmul.f32 0.03125, %v50_v20 }
 0x12c   :  { %v54_v22 = vadd.f32 1e-12, %v52_v21 }
 0x12e   :  { %3483 = vrsqrt.f32 %v54_v22 }
 0x134   :  { %v3482_v23 = vpop.eup %3481 }
 0x135   :  { %v57_v24 = vmul.f32 %v3482_v23, %v41_v6  ;;  %v80_v6 = vcombine.high %v2954_v4, %v2954_v4 }
 0x137   :  { %v63_v28 = vmul.f32 %v2952_v25, %v57_v24  ;;  %v94_v9 = vrot.slane %v80_v6, %v86_v5 }
 0x138   :  { %v3484_v26 = vpop.eup %3483 }
 0x139   :  { %v58_v27 = vmul.f32 %v3484_v26, %v42_v10  ;;  %v3657_v31 = vadd.f32 %v2953_v29, %v63_v28  ;;  %v3732_v10 = vrot.slane %v87_v7, %v97_v8  ;;  %v3734_v11 = vrot.slane %v94_v9, %v97_v8 }
 0x13b   :  { %v64_v30 = vmul.f32 %v2952_v25, %v58_v27 }
 0x13d   :  { %v3659_v32 = vadd.f32 %v2953_v29, %v64_v30 }
 0x13f   :  { %v113_v33 = vpack.c.bf16 %v3659_v32, %v3657_v31 }
 0x141   :  { %3160 = vmatmul.mubr.msk.bf16.vlgmr.msra.gmra.mrb[0].mxu1 %vm31_vm0, %v113_v33 }
 0x142   :  { %3165 = vmatprep.mubr.msk.bf16.mxu1 %vm3574_vm1, %v3573_v15 }
 0x214   :  { %v171_v35 = vpop.f32.mrb[0].mxu1 }
 0x215   :  { %v172_v36 = vadd.f32 %v2955_v34, %v171_v35  ;;  %v3161_v37 = vpop.f32.mrb[1].mxu1 }
 0x216   :  { %v174_v38 = vpop.f32.mrb[2].mxu1 }
 0x217   :  { %v178_v39 = vmul.f32 0.35355338, %v172_v36  ;;  %v3669_v40 = vpack.c.bf16 %v172_v36, %v172_v36  ;;  %v175_v41 = vadd.f32 %v2955_v34, %v174_v38  ;;  %v3162_v42 = vpop.f32.mrb[3].mxu1 }
 0x219   :  { %v3671_v43 = vpack.c.bf16 %v175_v41, %v175_v41  ;;  %185 = vrot.lane.b32.xlu0 %v3669_v40, %s3575_s14  ;;  %v3675_v44 = vpack.c.bf16 %v178_v39, %v178_v39  ;;  %v179_v45 = vmul.f32 0.35355338, %v175_v41 }
 0x21b   :  { %235 = vrot.lane.b32.xlu1 %v3671_v43, %s3575_s14  ;;  %v3687_v46 = vpack.c.bf16 %v179_v45, %v179_v45 }
 0x21d   :  { %284 = vrot.lane.b32.xlu0 %v3675_v44, %s3576_s15 }
 0x21f   :  { %286 = vrot.lane.b32.xlu1 %v3669_v40, %s3577_s16 }
 0x221   :  { %387 = vrot.lane.b32.xlu0 %v3669_v40, %s3578_s17 }
 0x223   :  { %337 = vrot.lane.b32.xlu1 %v3671_v43, %s3577_s16 }
 0x225   :  { %385 = vrot.lane.b32.xlu0 %v3675_v44, %s3579_s18 }
 0x227   :  { %335 = vrot.lane.b32.xlu1 %v3687_v46, %s3576_s15 }
 0x22b   :  { %437 = vrot.lane.b32.xlu1 %v3671_v43, %s3578_s17 }
 0x22f   :  { %435 = vrot.lane.b32.xlu1 %v3687_v46, %s3579_s18 }
 0x28b   :  { %v186_v47 = vpop.permute.xlu0 %185 }
 0x28c   :  { %v192_v48 = vsel %vm187_vm2, %v186_v47, 0 }
 0x28d   :  { %3164 = vmatpush3.bf16.xpose.msra.mxu1 %v192_v48  ;;  %v236_v49 = vpop.permute.xlu1 %235 }
 0x28e   :  { %v241_v50 = vsel %vm187_vm2, %v236_v49, 0  ;;  %3175 = vmatprep.subr.bf16.mxu1 %v3573_v15 }
 0x28f   :  { %3170 = vmatpush3.bf16.xpose.msra.mxu0 %v241_v50  ;;  %v285_v52 = vpop.permute.xlu0 %284 }
 0x290   :  { %3181 = vmatprep.subr.bf16.mxu0 %v3573_v15 }
 0x291   :  { %v287_v51 = vpop.permute.xlu1 %286 }
 0x292   :  { %v292_v53 = vsel %vm187_vm2, %v287_v51, 0 }
 0x293   :  { %v388_v56 = vpop.permute.xlu0 %387 }
 0x294   :  { %3166 = vmatmul.mubr.msk.bf16.vlgmr.msra.gmra.mrb[4].mxu1 %vm187_vm2, %v3675_v44  ;;  %v393_v58 = vsel %vm187_vm2, %v388_v56, 0 }
 0x295   :  { %3176 = vmatpush3.bf16.xpose.msra.mxu1 %v292_v53  ;;  %v338_v54 = vpop.permute.xlu1 %337  ;;  %3177 = vmatprep.mubr.msk.bf16.mxu1 %vm3574_vm1, %v3573_v15 }
 0x296   :  { %v343_v55 = vsel %vm187_vm2, %v338_v54, 0  ;;  %3172 = vmatmul.mubr.msk.bf16.vlgmr.msra.gmra.mrb[0].mxu0 %vm187_vm2, %v3687_v46  ;;  %3187 = vmatprep.subr.bf16.mxu1 %v3573_v15 }
 0x297   :  { %3182 = vmatpush3.bf16.xpose.msra.mxu0 %v343_v55  ;;  %3183 = vmatprep.mubr.msk.bf16.mxu0 %vm3574_vm1, %v3573_v15  ;;  %v386_v61 = vpop.permute.xlu0 %385 }
 0x298   :  { %3193 = vmatprep.subr.bf16.mxu0 %v3573_v15 }
 0x299   :  { %v336_v57 = vpop.permute.xlu1 %335 }
 0x29c   :  { %3178 = vmatmul.mubr.msk.bf16.vlgmr.msra.gmra.mrb[8].mxu1 %vm187_vm2, %v285_v52 }
 0x29d   :  { %3188 = vmatpush3.bf16.xpose.msra.mxu1 %v393_v58  ;;  %v438_v59 = vpop.permute.xlu1 %437  ;;  %3189 = vmatprep.mubr.msk.bf16.mxu1 %vm3574_vm1, %v3573_v15 }
 0x29e   :  { %v443_v60 = vsel %vm187_vm2, %v438_v59, 0  ;;  %3184 = vmatmul.mubr.msk.bf16.vlgmr.msra.gmra.mrb[4].mxu0 %vm187_vm2, %v336_v57  ;;  %3199 = vmatprep.subr.bf16.mxu1 %v3573_v15 }
 0x29f   :  { %3194 = vmatpush3.bf16.xpose.msra.mxu0 %v443_v60  ;;  %3195 = vmatprep.mubr.msk.bf16.mxu0 %vm3574_vm1, %v3573_v15 }
 0x2a0   :  { %3205 = vmatprep.subr.bf16.mxu0 %v3573_v15 }
 0x2a1   :  { %v436_v62 = vpop.permute.xlu1 %435 }
 0x2a4   :  { %3190 = vmatmul.mubr.msk.bf16.vlgmr.msra.gmra.mrb[12].mxu1 %vm187_vm2, %v386_v61 }
 0x2a5   :  { %3201 = vmatprep.mubr.msk.bf16.mxu1 %vm3574_vm1, %v3573_v15 }
 0x2a6   :  { %3196 = vmatmul.mubr.msk.bf16.vlgmr.msra.gmra.mrb[8].mxu0 %vm187_vm2, %v436_v62 }
 0x2a7   :  { %3207 = vmatprep.mubr.msk.bf16.mxu0 %vm3574_vm1, %v3573_v15 }
 0x367   :  { %v228_v12 = vpop.f32.mrb[4].mxu1 }
 0x368   :  { %v585_v13 = vadd.f32 %v228_v12, %v3732_v10  ;;  %v3167_v14 = vpop.f32.mrb[5].mxu1 }
 0x369   :  { %v231_v16 = vpop.f32.mrb[6].mxu1  ;;  %v277_v17 = vpop.f32.mrb[0].mxu0 }
 0x36a   :  { %v586_v18 = vadd.f32 %v277_v17, %v3734_v11  ;;  %v3168_v19 = vpop.f32.mrb[7].mxu1  ;;  %v3173_v20 = vpop.f32.mrb[1].mxu0  ;;  %v593_v21 = vsel %vm187_vm2, %v585_v13, -inf }
 0x36b   :  { %v280_v22 = vpop.f32.mrb[2].mxu0  ;;  %594 = vmax.xlane.f32.xlu0 %v593_v21 }
 0x36c   :  { %v3174_v23 = vpop.f32.mrb[3].mxu0  ;;  %v596_v24 = vsel %vm187_vm2, %v586_v18, -inf }
 0x36d   :  { %597 = vmax.xlane.f32.xlu1 %v596_v24 }
 0x36f   :  { %v328_v25 = vpop.f32.mrb[8].mxu1 }
 0x370   :  { %v587_v26 = vadd.f32 %v328_v25, %v3732_v10  ;;  %v3179_v27 = vpop.f32.mrb[9].mxu1 }
 0x371   :  { %v331_v28 = vpop.f32.mrb[10].mxu1  ;;  %v379_v29 = vpop.f32.mrb[4].mxu0 }
 0x372   :  { %v588_v30 = vadd.f32 %v379_v29, %v3734_v11  ;;  %v3180_v33 = vpop.f32.mrb[11].mxu1  ;;  %v3185_v34 = vpop.f32.mrb[5].mxu0  ;;  %v599_v35 = vsel %vm187_vm2, %v587_v26, -inf }
 0x373   :  { %v382_v36 = vpop.f32.mrb[6].mxu0  ;;  %600 = vmax.xlane.f32.xlu0 %v599_v35 }
 0x374   :  { %v3186_v37 = vpop.f32.mrb[7].mxu0  ;;  %v602_v38 = vsel %vm187_vm2, %v588_v30, -inf }
 0x377   :  { %603 = vmax.xlane.f32.xlu0 %v602_v38  ;;  %v3744_v39 = vpop.f32.mrb[12].mxu1 }
 0x378   :  { %v3191_v41 = vpop.f32.mrb[13].mxu1 }
 0x379   :  { %v432_v42 = vpop.f32.mrb[14].mxu1  ;;  %v3746_v45 = vpop.f32.mrb[8].mxu0 }
 0x37a   :  { %v3192_v47 = vpop.f32.mrb[15].mxu1  ;;  %v3197_v48 = vpop.f32.mrb[9].mxu0  ;;  %v590_v19 = vadd.f32 %v3746_v45, %v3734_v11 }
 0x37b   :  { %v482_v49 = vpop.f32.mrb[10].mxu0 }
 0x37c   :  { %v3198_v50 = vpop.f32.mrb[11].mxu0  ;;  %v608_v21 = vsel %vm187_vm2, %v590_v19, -inf }
 0x37e   :  { %537 = vrot.lane.b32.xlu1 %v3671_v43, %s3581_s1 }
 0x382   :  { %485 = vrot.lane.b32.xlu1 %v3675_v44, %s3582_s21 }
 0x386   :  { %535 = vrot.lane.b32.xlu1 %v3687_v46, %s3582_s21 }
 0x38a   :  { %738 = vrot.lane.b32.xlu1 %v3671_v43, %s3583_s22 }
 0x38d   :  { %487 = vrot.lane.b32.xlu0 %v3669_v40, %s3581_s1 }
 0x391   :  { %689 = vrot.lane.b32.xlu0 %v3669_v40, %s3583_s22 }
 0x3f8   :  { %v595_v51 = vpop.xlane.xlu0 %594 }
 0x3f9   :  { %v617_v52 = vsub.f32 %v585_v13, %v595_v51 }
 0x3fa   :  { %v598_v53 = vpop.xlane.xlu1 %597 }
 0x3fb   :  { %v625_v54 = vmul.f32 1.442695, %v617_v52  ;;  %v618_v55 = vsub.f32 %v586_v18, %v598_v53  ;;  %v589_v18 = vadd.f32 %v3744_v39, %v3732_v10 }
 0x3fd   :  { %3485 = vpow2.f32 %v625_v54  ;;  %v627_v44 = vmul.f32 1.442695, %v618_v55  ;;  %v605_v20 = vsel %vm187_vm2, %v589_v18, -inf }
 0x3fe   :  { %v538_v56 = vpop.permute.xlu1 %537 }
 0x3ff   :  { %3487 = vpow2.f32 %v627_v44  ;;  %v543_v46 = vsel %vm187_vm2, %v538_v56, 0 }
 0x400   :  { %3206 = vmatpush3.bf16.xpose.msra.mxu0 %v543_v46  ;;  %v601_v57 = vpop.xlane.xlu0 %600 }
 0x401   :  { %v619_v58 = vsub.f32 %v587_v26, %v601_v57  ;;  %3217 = vmatprep.subr.bf16.mxu0 %v3573_v15 }
 0x402   :  { %v486_v59 = vpop.permute.xlu1 %485 }
 0x403   :  { %v629_v60 = vmul.f32 1.442695, %v619_v58 }
 0x404   :  { %v604_v61 = vpop.xlane.xlu0 %603 }
 0x405   :  { %3489 = vpow2.f32 %v629_v60  ;;  %v620_v62 = vsub.f32 %v588_v30, %v604_v61 }
 0x406   :  { %v536_v63 = vpop.permute.xlu1 %535 }
 0x407   :  { %v3486_v0 = vpop.eup %3485  ;;  %v631_v1 = vmul.f32 1.442695, %v620_v62  ;;  %3208 = vmatmul.mubr.msk.bf16.vlgmr.msra.gmra.mrb[12].mxu0 %vm187_vm2, %v536_v63 }
 0x408   :  { %v488_v2 = vpop.permute.xlu0 %487  ;;  %v641_v3 = vsel %vm187_vm2, %v3486_v0, 0.0  ;;  %3219 = vmatprep.mubr.msk.bf16.mxu0 %vm3574_vm1, %v3573_v15 }
 0x409   :  { %v3488_v4 = vpop.eup %3487  ;;  %3491 = vpow2.f32 %v631_v1  ;;  %v493_v5 = vsel %vm187_vm2, %v488_v2, 0  ;;  %642 = vadd.xlane.f32.xlu0 %v641_v3  ;;  %v787_v2 = vld [vmem:[%s4224_s4] sm:$0xf] }
 0x40a   :  { %v739_v6 = vpop.permute.xlu1 %738  ;;  %3200 = vmatpush3.bf16.xpose.msra.mxu1 %v493_v5  ;;  %v644_v7 = vsel %vm187_vm2, %v3488_v4, 0.0  ;;  %v937_v3 = vsel %vm694_vm3, %v787_v2, 0 }
 0x40b   :  { %v744_v8 = vsel %vm694_vm3, %v739_v6, 0  ;;  %645 = vadd.xlane.f32.xlu1 %v644_v7  ;;  %3211 = vmatprep.subr.bf16.mxu1 %v3573_v15 }
 0x40c   :  { %3218 = vmatpush3.bf16.msra.mxu0 %v744_v8  ;;  %v690_v9 = vpop.permute.xlu0 %689 }
 0x40d   :  { %3229 = vmatprep.subr.bf16.mxu0 %v3573_v15  ;;  %v696_v14 = vsel %vm694_vm3, %v690_v9, 0 }
 0x40f   :  { %v3490_v12 = vpop.eup %3489 }
 0x410   :  { %v647_v13 = vsel %vm187_vm2, %v3490_v12, 0.0 }
 0x411   :  { %648 = vadd.xlane.f32.xlu0 %v647_v13  ;;  %3202 = vmatmul.mubr.msk.bf16.vlgmr.msra.gmra.mrb[16].mxu1 %vm187_vm2, %v486_v59 }
 0x412   :  { %3212 = vmatpush3.bf16.msra.mxu1 %v696_v14  ;;  %3213 = vmatprep.mubr.msk.bf16.mxu1 %vm3574_vm1, %v3573_v15 }
 0x413   :  { %v3492_v16 = vpop.eup %3491  ;;  %3223 = vmatprep.subr.bf16.mxu1 %v3573_v15 }
 0x414   :  { %v650_v17 = vsel %vm187_vm2, %v3492_v16, 0.0 }
 0x415   :  { %651 = vadd.xlane.f32.xlu1 %v650_v17 }
 0x426   :  { %836 = vrot.lane.b32.xlu1 %v3671_v43, %s3584_s23 }
 0x427   :  { %788 = vrot.lane.b32.xlu0 %v3669_v40, %s3584_s23 }
 0x446   :  { %606 = vmax.xlane.f32.xlu0 %v605_v20 }
 0x44a   :  { %609 = vmax.xlane.f32.xlu1 %v608_v21 }
 0x45b   :  { %1028 = vrot.lane.b32.xlu1 %v3671_v43, %s3585_s24 }
 0x496   :  { %v643_v22 = vpop.xlane.xlu0 %642 }
 0x497   :  { %3493 = vrcp.f32 %v643_v22 }
 0x498   :  { %v646_v23 = vpop.xlane.xlu1 %645 }
 0x499   :  { %3495 = vrcp.f32 %v646_v23 }
 0x49e   :  { %v649_v24 = vpop.xlane.xlu0 %648 }
 0x49f   :  { %3497 = vrcp.f32 %v649_v24 }
 0x4a1   :  { %v3494_v25 = vpop.eup %3493 }
 0x4a2   :  { %v666_v26 = vmul.f32 %v3494_v25, %v3486_v0  ;;  %v652_v27 = vpop.xlane.xlu1 %651  ;;  %v789_v29 = vpop.permute.xlu0 %788 }
 0x4a3   :  { %v3496_v28 = vpop.eup %3495  ;;  %3499 = vrcp.f32 %v652_v27  ;;  %v794_v34 = vsel %vm694_vm3, %v789_v29, 0 }
 0x4a4   :  { %v668_v30 = vmul.f32 %v3496_v28, %v3488_v4  ;;  %v681_v33 = vpack.c.bf16 %v666_v26, %v666_v26  ;;  %v885_v4 = vld [vmem:[%s4224_s4 + $0x4] sm:$0xf] }
 0x4a5   :  { %v890_v5 = vsel %vm694_vm3, %v885_v4, 0 }
 0x4a6   :  { %v837_v35 = vpop.permute.xlu1 %836  ;;  %3214 = vmatmul.mubr.msk.bf16.vlgmr.msra.gmra.mrb[20].mxu1 %vm187_vm2, %v681_v33  ;;  %v682_v36 = vpack.c.bf16 %v668_v30, %v668_v30 }
 0x4a7   :  { %v842_v37 = vsel %vm694_vm3, %v837_v35, 0  ;;  %3224 = vmatpush3.bf16.msra.mxu1 %v794_v34  ;;  %3225 = vmatprep.mubr.msk.bf16.mxu1 %vm3574_vm1, %v3573_v15 }
 0x4a8   :  { %3220 = vmatmul.mubr.msk.bf16.vlgmr.msra.gmra.mrb[16].mxu0 %vm187_vm2, %v682_v36  ;;  %3235 = vmatprep.subr.bf16.mxu1 %v3573_v15 }
 0x4a9   :  { %v3498_v38 = vpop.eup %3497  ;;  %3230 = vmatpush3.bf16.msra.mxu0 %v842_v37  ;;  %3231 = vmatprep.mubr.msk.bf16.mxu0 %vm3574_vm1, %v3573_v15 }
 0x4aa   :  { %v670_v39 = vmul.f32 %v3498_v38, %v3490_v12  ;;  %3241 = vmatprep.subr.bf16.mxu0 %v3573_v15 }
 0x4ac   :  { %v683_v41 = vpack.c.bf16 %v670_v39, %v670_v39 }
 0x4ad   :  { %v3500_v42 = vpop.eup %3499 }
 0x4ae   :  { %v672_v45 = vmul.f32 %v3500_v42, %v3492_v16  ;;  %3226 = vmatmul.mubr.msk.bf16.vlgmr.msra.gmra.mrb[24].mxu1 %vm187_vm2, %v683_v41 }
 0x4af   :  { %3237 = vmatprep.mubr.msk.bf16.mxu1 %vm3574_vm1, %v3573_v15  ;;  %3236 = vmatpush3.bf16.msra.mxu1 %v890_v5 }
 0x4b0   :  { %v684_v47 = vpack.c.bf16 %v672_v45, %v672_v45  ;;  %3247 = vmatprep.subr.bf16.mxu1 %v3573_v15 }
 0x4b2   :  { %3232 = vmatmul.mubr.msk.bf16.vlgmr.msra.gmra.mrb[20].mxu0 %vm187_vm2, %v684_v47 }
 0x4b3   :  { %3243 = vmatprep.mubr.msk.bf16.mxu0 %vm3574_vm1, %v3573_v15  ;;  %3242 = vmatpush3.bf16.msra.mxu0 %v937_v3 }
 0x4b4   :  { %3253 = vmatprep.subr.bf16.mxu0 %v3573_v15 }
 0x4d3   :  { %v607_v48 = vpop.xlane.xlu0 %606 }
 0x4d4   :  { %v621_v49 = vsub.f32 %v589_v18, %v607_v48 }
 0x4d6   :  { %v633_v50 = vmul.f32 1.442695, %v621_v49 }
 0x4d7   :  { %v610_v51 = vpop.xlane.xlu1 %609 }
 0x4d8   :  { %3501 = vpow2.f32 %v633_v50  ;;  %v622_v52 = vsub.f32 %v590_v19, %v610_v51 }
 0x4da   :  { %v635_v53 = vmul.f32 1.442695, %v622_v52  ;;  %v579_v54 = vpop.f32.mrb[12].mxu0 }
 0x4db   :  { %v3209_v55 = vpop.f32.mrb[13].mxu0  ;;  %v592_v6 = vadd.f32 %v579_v54, %v3734_v11  ;;  %v1029_v8 = vpop.permute.xlu1 %1028 }
 0x4dc   :  { %3503 = vpow2.f32 %v635_v53  ;;  %v582_v44 = vpop.f32.mrb[14].mxu0  ;;  %v1034_v25 = vsel %vm694_vm3, %v1029_v8, 0 }
 0x4dd   :  { %v3210_v56 = vpop.f32.mrb[15].mxu0  ;;  %v614_v7 = vsel %vm187_vm2, %v592_v6, -inf }
 0x4de   :  { %v1077_v56 = vld [vmem:[%s4224_s4 + $0x8] sm:$0xf] }
 0x4e2   :  { %v3806_v46 = vpop.eup %3501 }
 0x4e3   :  { %v653_v57 = vsel %vm187_vm2, %v3806_v46, 0.0 }
 0x4e4   :  { %654 = vadd.xlane.f32.xlu0 %v653_v57  ;;  %v529_v58 = vpop.f32.mrb[16].mxu1 }
 0x4e5   :  { %v591_v59 = vadd.f32 %v529_v58, %v3732_v10  ;;  %v3203_v60 = vpop.f32.mrb[17].mxu1 }
 0x4e6   :  { %v3504_v61 = vpop.eup %3503  ;;  %v532_v62 = vpop.f32.mrb[18].mxu1 }
 0x4e7   :  { %v3204_v63 = vpop.f32.mrb[19].mxu1  ;;  %v656_v0 = vsel %vm187_vm2, %v3504_v61, 0.0  ;;  %v611_v1 = vsel %vm187_vm2, %v591_v59, -inf }
 0x4e8   :  { %657 = vadd.xlane.f32.xlu0 %v656_v0  ;;  %612 = vmax.xlane.f32.xlu1 %v611_v1 }
 0x4fe   :  { %980 = vrot.lane.b32.xlu0 %v3669_v40, %s3585_s24 }
 0x51d   :  { %615 = vmax.xlane.f32.xlu0 %v614_v7 }
 0x571   :  { %v655_v9 = vpop.xlane.xlu0 %654 }
 0x575   :  { %v658_v12 = vpop.xlane.xlu0 %657  ;;  %v613_v13 = vpop.xlane.xlu1 %612 }
 0x576   :  { %3505 = vrcp.f32 %v658_v12  ;;  %v623_v14 = vsub.f32 %v591_v59, %v613_v13 }
 0x578   :  { %v637_v16 = vmul.f32 1.442695, %v623_v14 }
 0x579   :  { %v732_v17 = vpop.f32.mrb[20].mxu1  ;;  %v981_v37 = vpop.permute.xlu0 %980 }
 0x57a   :  { %3507 = vpow2.f32 %v637_v16  ;;  %v3215_v18 = vpop.f32.mrb[21].mxu1  ;;  %v986_v48 = vsel %vm694_vm3, %v981_v37, 0 }
 0x57b   :  { %v735_v19 = vpop.f32.mrb[22].mxu1  ;;  %v780_v20 = vpop.f32.mrb[16].mxu0  ;;  %3509 = vrcp.f32 %v655_v9 }
 0x57c   :  { %v786_v21 = vpack.c.bf16 %v780_v20, %v732_v17  ;;  %v3216_v22 = vpop.f32.mrb[23].mxu1  ;;  %v3221_v23 = vpop.f32.mrb[17].mxu0 }
 0x57d   :  { %v783_v24 = vpop.f32.mrb[18].mxu0 }
 0x57e   :  { %v3222_v26 = vpop.f32.mrb[19].mxu0  ;;  %3244 = vmatmul.mubr.msk.bf16.vlgmr.msra.gmra.mrb[24].mxu0 %vm187_vm2, %v786_v21 }
 0x57f   :  { %3254 = vmatpush3.bf16.msra.mxu0 %v1034_v25  ;;  %3255 = vmatprep.mubr.msk.bf16.mxu0 %vm3574_vm1, %v3573_v15  ;;  %v1224_v25 = vld [vmem:[%s4224_s4 + $0xc] sm:$0xf] }
 0x580   :  { %v3506_v27 = vpop.eup %3505  ;;  %3265 = vmatprep.subr.bf16.mxu0 %v3573_v15  ;;  %v1229_v26 = vsel %vm694_vm3, %v1224_v25, 0  ;;  %v3471_v25 = vld [vmem:[%s4226_s6 + $0x10] sm:$0xff]  }
 0x581   :  { %v676_v28 = vmul.f32 %v3506_v27, %v3504_v61  ;;  %v830_v29 = vpop.f32.mrb[24].mxu1 }
 0x582   :  { %v3227_v30 = vpop.f32.mrb[25].mxu1 }
 0x583   :  { %v833_v33 = vpop.f32.mrb[26].mxu1  ;;  %v686_v34 = vpack.c.bf16 %v676_v28, %v676_v28 }
 0x584   :  { %v3508_v35 = vpop.eup %3507  ;;  %v3228_v36 = vpop.f32.mrb[27].mxu1 }
 0x585   :  { %v878_v38 = vpop.f32.mrb[20].mxu0  ;;  %v659_v39 = vsel %vm187_vm2, %v3508_v35, 0.0  ;;  %v3510_v45 = vpop.eup %3509 }
 0x586   :  { %v884_v41 = vpack.c.bf16 %v878_v38, %v830_v29  ;;  %v3233_v42 = vpop.f32.mrb[21].mxu0  ;;  %660 = vadd.xlane.f32.xlu0 %v659_v39  ;;  %3256 = vmatmul.mubr.msk.bf16.vlgmr.msra.gmra.mrb[28].mxu0 %vm187_vm2, %v686_v34  ;;  %v674_v50 = vmul.f32 %v3510_v45, %v3806_v46  ;;  %v1082_v46 = vsel %vm694_vm3, %v1077_v56, 0 }
 0x587   :  { %v881_v47 = vpop.f32.mrb[22].mxu0  ;;  %3267 = vmatprep.mubr.msk.bf16.mxu0 %vm3574_vm1, %v3573_v15 }
 0x588   :  { %v3234_v49 = vpop.f32.mrb[23].mxu0  ;;  %3238 = vmatmul.mubr.msk.bf16.vlgmr.msra.gmra.mrb[28].mxu1 %vm187_vm2, %v884_v41  ;;  %v685_v51 = vpack.c.bf16 %v674_v50, %v674_v50 }
 0x589   :  { %3248 = vmatpush3.bf16.msra.mxu1 %v986_v48  ;;  %3249 = vmatprep.mubr.msk.bf16.mxu1 %vm3574_vm1, %v3573_v15 }
 0x58a   :  { %3259 = vmatprep.subr.bf16.mxu1 %v3573_v15 }
 0x590   :  { %3250 = vmatmul.mubr.msk.bf16.vlgmr.msra.gmra.mrb[32].mxu1 %vm187_vm2, %v685_v51 }
 0x591   :  { %3261 = vmatprep.mubr.msk.bf16.mxu1 %vm3574_vm1, %v3573_v15  ;;  %3260 = vmatpush3.bf16.msra.mxu1 %v1082_v46 }
 0x592   :  { %3271 = vmatprep.subr.bf16.mxu1 %v3573_v15 }
 0x59c   :  { %1127 = vrot.lane.b32.xlu0 %v3669_v40, %s3586_s28 }
 0x5aa   :  { %v616_v52 = vpop.xlane.xlu0 %615 }
 0x5ab   :  { %v624_v53 = vsub.f32 %v592_v6, %v616_v52  ;;  %v2979_v52 = vld [vmem:[%s4222_s2 + $0x3] ss:$0 sm:$0xff] }
 0x5ad   :  { %v639_v54 = vmul.f32 1.442695, %v624_v53 }
 0x5af   :  { %3511 = vpow2.f32 %v639_v54 }
 0x5b9   :  { %v3512_v55 = vpop.eup %3511 }
 0x5ba   :  { %v662_v44 = vsel %vm187_vm2, %v3512_v55, 0.0 }
 0x5bb   :  { %663 = vadd.xlane.f32.xlu1 %v662_v44 }
 0x5cc   :  { %1175 = vrot.lane.b32.xlu1 %v3671_v43, %s3586_s28 }
 0x613   :  { %v661_v40 = vpop.xlane.xlu0 %660 }
 0x614   :  { %3513 = vrcp.f32 %v661_v40 }
 0x617   :  { %v1128_v57 = vpop.permute.xlu0 %1127 }
 0x618   :  { %v1133_v58 = vsel %vm694_vm3, %v1128_v57, 0 }
 0x619   :  { %3266 = vmatpush3.bf16.msra.mxu0 %v1133_v58 }
 0x61a   :  { %3277 = vmatprep.subr.bf16.mxu0 %v3573_v15 }
 0x61e   :  { %v3514_v59 = vpop.eup %3513 }
 0x61f   :  { %v678_v60 = vmul.f32 %v3514_v59, %v3508_v35 }
 0x621   :  { %v687_v43 = vpack.c.bf16 %v678_v60, %v678_v60 }
 0x623   :  { %3268 = vmatmul.mubr.msk.bf16.vlgmr.msra.gmra.mrb[32].mxu0 %vm187_vm2, %v687_v43 }
 0x624   :  { %3279 = vmatprep.mubr.msk.bf16.mxu0 %vm3574_vm1, %v3573_v15  ;;  %3278 = vmatpush3.bf16.msra.mxu0 %v1229_v26  ;;  %v3472_v26 = vld [vmem:[%s4226_s6 + $0x18] sm:$0xff]  }
 0x625   :  { %3291 = vmatprep.subr.bf16.mxu0 %v3573_v15 }
 0x648   :  { %v664_v1 = vpop.xlane.xlu1 %663 }
 0x649   :  { %3515 = vrcp.f32 %v664_v1  ;;  %v3467_v1 = vld [vmem:[%s4225_s5] sm:$0xff]  }
 0x64c   :  { %v1176_v14 = vpop.permute.xlu1 %1175 }
 0x64d   :  { %v1181_v21 = vsel %vm694_vm3, %v1176_v14, 0 }
 0x651   :  { %v973_v61 = vpop.f32.mrb[24].mxu0 }
 0x652   :  { %v3245_v62 = vpop.f32.mrb[25].mxu0 }
 0x653   :  { %v976_v63 = vpop.f32.mrb[26].mxu0  ;;  %v3516_v19 = vpop.eup %3515 }
 0x654   :  { %v3246_v0 = vpop.f32.mrb[27].mxu0  ;;  %v680_v23 = vmul.f32 %v3516_v19, %v3512_v55 }
 0x656   :  { %v688_v24 = vpack.c.bf16 %v680_v23, %v680_v23  ;;  %v3469_v23 = vld [vmem:[%s4226_s6] sm:$0xff]  }
 0x659   :  { %v1070_v2 = vpop.f32.mrb[28].mxu0 }
 0x65a   :  { %v3257_v3 = vpop.f32.mrb[29].mxu0 }
 0x65b   :  { %v926_v4 = vpop.f32.mrb[28].mxu1  ;;  %v1073_v5 = vpop.f32.mrb[30].mxu0 }
 0x65c   :  { %v974_v6 = vadd.f32 %v973_v61, %v926_v4  ;;  %v3239_v7 = vpop.f32.mrb[29].mxu1  ;;  %v3258_v8 = vpop.f32.mrb[31].mxu0 }
 0x65d   :  { %v929_v9 = vpop.f32.mrb[30].mxu1 }
 0x65e   :  { %v977_v12 = vadd.f32 %v976_v63, %v929_v9  ;;  %v3240_v13 = vpop.f32.mrb[31].mxu1 }
 0x663   :  { %v1022_v16 = vpop.f32.mrb[32].mxu1 }
 0x664   :  { %v1076_v17 = vpack.c.bf16 %v1070_v2, %v1022_v16  ;;  %v3251_v18 = vpop.f32.mrb[33].mxu1  ;;  %v3468_v2 = vld [vmem:[%s4225_s5 + $0x8] sm:$0xff]  }
 0x665   :  { %v1025_v20 = vpop.f32.mrb[34].mxu1  ;;  %v2981_v18 = vld [vmem:[%s4222_s2 + $0x5] ss:$0 sm:$0xff] }
 0x666   :  { %v3252_v22 = vpop.f32.mrb[35].mxu1  ;;  %3262 = vmatmul.mubr.msk.bf16.vlgmr.msra.gmra.mrb[36].mxu1 %vm187_vm2, %v1076_v17 }
 0x667   :  { %3272 = vmatpush3.bf16.msra.mxu1 %v1181_v21  ;;  %3273 = vmatprep.mubr.msk.bf16.mxu1 %vm3574_vm1, %v3573_v15 }
 0x668   :  { %3283 = vmatprep.subr.bf16.mxu1 %v3573_v15 }
 0x66e   :  { %3274 = vmatmul.mubr.msk.bf16.vlgmr.msra.gmra.mrb[40].mxu1 %vm187_vm2, %v688_v24  ;;  %v3470_v24 = vld [vmem:[%s4226_s6 + $0x8] sm:$0xff]  }
 0x66f   :  { %3287 = vmatprep.mubr.msk.bf16.mxu1 %vm3574_vm1, %v3573_v15  ;;  %3284 = vmatpush3.bf16.msra.mxu1 %v3467_v1 }
 0x670   :  { %3285 = vmatprep.subr.bf16.mxu1 %v3573_v15 }
 0x673   :  { %3286 = vmatpush3.bf16.msra.mxu1 %v3468_v2 }
 0x674   :  { %3303 = vmatprep.subr.bf16.mxu1 %v3573_v15 }
 0x6f6   :  { %v1169_v27 = vpop.f32.mrb[32].mxu0 }
 0x6f7   :  { %v3269_v28 = vpop.f32.mrb[33].mxu0 }
 0x6f8   :  { %v1172_v29 = vpop.f32.mrb[34].mxu0 }
 0x6f9   :  { %v3270_v30 = vpop.f32.mrb[35].mxu0 }
 0x739   :  { %v1118_v33 = vpop.f32.mrb[36].mxu1 }
 0x73a   :  { %v1125_v34 = vadd.f32 %v1118_v33, %v974_v6  ;;  %v3263_v35 = vpop.f32.mrb[37].mxu1 }
 0x73b   :  { %v1121_v36 = vpop.f32.mrb[38].mxu1 }
 0x73c   :  { %v1126_v37 = vadd.f32 %v1121_v36, %v977_v12  ;;  %v3264_v38 = vpop.f32.mrb[39].mxu1  ;;  %v2980_v12 = vld [vmem:[%s4222_s2 + $0x4] ss:$0 sm:$0xff] }
 0x741   :  { %v1217_v39 = vpop.f32.mrb[40].mxu1 }
 0x742   :  { %v1223_v41 = vpack.c.bf16 %v1217_v39, %v1169_v27  ;;  %v3275_v42 = vpop.f32.mrb[41].mxu1  ;;  %v2982_v27 = vld [vmem:[%s4222_s2 + $0x6] ss:$0 sm:$0xff] }
 0x743   :  { %v1220_v45 = vpop.f32.mrb[42].mxu1 }
 0x744   :  { %v3276_v47 = vpop.f32.mrb[43].mxu1  ;;  %3280 = vmatmul.mubr.msk.bf16.vlgmr.msra.gmra.mrb[36].mxu0 %vm187_vm2, %v1223_v41 }
 0x745   :  { %3299 = vmatprep.mubr.msk.bf16.mxu0 %vm3574_vm1, %v3573_v15  ;;  %3292 = vmatpush3.bf16.msra.mxu0 %v3469_v23 }
 0x746   :  { %3293 = vmatprep.subr.bf16.mxu0 %v3573_v15 }
 0x749   :  { %3294 = vmatpush3.bf16.msra.mxu0 %v3470_v24 }
 0x74a   :  { %3295 = vmatprep.subr.bf16.mxu0 %v3573_v15 }
 0x74d   :  { %3296 = vmatpush3.bf16.msra.mxu0 %v3471_v25 }
 0x74e   :  { %3297 = vmatprep.subr.bf16.mxu0 %v3573_v15 }
 0x751   :  { %3298 = vmatpush3.bf16.msra.mxu0 %v3472_v26 }
 0x752   :  { %3317 = vmatprep.subr.bf16.mxu0 %v3573_v15 }
 0x817   :  { %v1265_v48 = vpop.f32.mrb[36].mxu0 }
 0x818   :  { %v1272_v49 = vadd.f32 %v1265_v48, %v1125_v34  ;;  %v3281_v50 = vpop.f32.mrb[37].mxu0 }
 0x819   :  { %v1268_v51 = vpop.f32.mrb[38].mxu0 }
 0x81a   :  { %v1274_v53 = vadd.f32 %v1272_v49, %v3657_v31  ;;  %v1273_v54 = vadd.f32 %v1268_v51, %v1126_v37  ;;  %v3282_v55 = vpop.f32.mrb[39].mxu0 }
 0x81c   :  { %v1275_v44 = vadd.f32 %v1273_v54, %v3659_v32  ;;  %v1280_v56 = vadd.f32 %v2979_v52, %v1274_v53 }
 0x81e   :  { %v1282_v46 = vsel %vm31_vm0, %v1280_v56, 0.0  ;;  %v1281_v40 = vadd.f32 %v2979_v52, %v1275_v44 }
 0x81f   :  { %1283 = vadd.xlane.f32.xlu1 %v1282_v46 }
 0x820   :  { %v1285_v57 = vsel %vm31_vm0, %v1281_v40, 0.0 }
 0x821   :  { %1286 = vadd.xlane.f32.xlu0 %v1285_v57 }
 0x8ac   :  { %v1284_v58 = vpop.xlane.xlu1 %1283 }
 0x8ad   :  { %v1288_v59 = vmul.f32 0.03125, %v1284_v58 }
 0x8ae   :  { %v1287_v60 = vpop.xlane.xlu0 %1286 }
 0x8af   :  { %v1290_v43 = vsub.f32 %v1280_v56, %v1288_v59  ;;  %v1289_v61 = vmul.f32 0.03125, %v1287_v60 }
 0x8b1   :  { %v1291_v62 = vsub.f32 %v1281_v40, %v1289_v61  ;;  %v1292_v63 = vmul.f32 %v1290_v43, %v1290_v43  ;;  %v2986_v40 = vld [vmem:[%s4222_s2 + $0x7] ss:$0 sm:$0xff] }
 0x8b3   :  { %v1294_v31 = vsel %vm31_vm0, %v1292_v63, 0.0  ;;  %v1293_v0 = vmul.f32 %v1291_v62, %v1291_v62 }
 0x8b4   :  { %1295 = vadd.xlane.f32.xlu0 %v1294_v31 }
 0x8b5   :  { %v1297_v32 = vsel %vm31_vm0, %v1293_v0, 0.0 }
 0x8b6   :  { %1298 = vadd.xlane.f32.xlu1 %v1297_v32 }
 0x941   :  { %v1296_v3 = vpop.xlane.xlu0 %1295 }
 0x942   :  { %v1300_v4 = vmul.f32 0.03125, %v1296_v3 }
 0x943   :  { %v1299_v5 = vpop.xlane.xlu1 %1298 }
 0x944   :  { %v1302_v6 = vadd.f32 1e-12, %v1300_v4  ;;  %v1301_v7 = vmul.f32 0.03125, %v1299_v5 }
 0x946   :  { %3517 = vrsqrt.f32 %v1302_v6  ;;  %v1303_v8 = vadd.f32 1e-12, %v1301_v7 }
 0x948   :  { %3519 = vrsqrt.f32 %v1303_v8 }
 0x950   :  { %v3518_v9 = vpop.eup %3517 }
 0x951   :  { %v1306_v13 = vmul.f32 %v3518_v9, %v1290_v43 }
 0x952   :  { %v3520_v14 = vpop.eup %3519 }
 0x953   :  { %v1312_v16 = vmul.f32 %v2980_v12, %v1306_v13  ;;  %v1307_v17 = vmul.f32 %v3520_v14, %v1291_v62  ;;  %v3474_v13 = vld [vmem:[%s4221_s3 + $0x18] sm:$0xff]  }
 0x955   :  { %v1313_v19 = vmul.f32 %v2980_v12, %v1307_v17  ;;  %v1318_v20 = vadd.f32 %v2981_v18, %v1312_v16  ;;  %v3473_v12 = vld [vmem:[%s4221_s3 + $0x10] sm:$0xff]  }
 0x957   :  { %v1319_v21 = vadd.f32 %v2981_v18, %v1313_v19 }
 0x959   :  { %v1320_v22 = vpack.c.bf16 %v1319_v21, %v1318_v20 }
 0x95b   :  { %3288 = vmatmul.mubr.msk.bf16.vlgmr.msra.gmra.mrb[44].mxu1 %vm31_vm0, %v1320_v22  ;;  %v2992_v22 = vld [vmem:[%s4222_s2 + $0x8] ss:$0 sm:$0xff] }
 0x95c   :  { %3307 = vmatprep.mubr.msk.bf16.mxu1 %vm3574_vm1, %v3573_v15  ;;  %3304 = vmatpush3.bf16.msra.mxu1 %v3473_v12 }
 0x95d   :  { %3305 = vmatprep.subr.bf16.mxu1 %v3573_v15 }
 0x960   :  { %3306 = vmatpush3.bf16.msra.mxu1 %v3474_v13 }
 0x961   :  { %3311 = vmatprep.subr.bf16.mxu1 %v3573_v15 }
 0xa2e   :  { %v1378_v28 = vpop.f32.mrb[44].mxu1 }
 0xa2f   :  { %v1379_v29 = vadd.f32 %v2982_v27, %v1378_v28  ;;  %v3289_v30 = vpop.f32.mrb[45].mxu1 }
 0xa30   :  { %v1381_v33 = vpop.f32.mrb[46].mxu1 }
 0xa31   :  { %v1387_v34 = vmul.f32 0.044715, %v1379_v29  ;;  %v1382_v35 = vadd.f32 %v2982_v27, %v1381_v33  ;;  %v3290_v36 = vpop.f32.mrb[47].mxu1  ;;  %v1385_v53 = vmul.f32 0.5, %v1379_v29  ;;  %v2993_v27 = vld [vmem:[%s4222_s2 + $0x9] ss:$0 sm:$0xff] }
 0xa33   :  { %v1389_v37 = vmul.f32 %v1387_v34, %v1379_v29  ;;  %v1388_v38 = vmul.f32 0.044715, %v1382_v35  ;;  %v1386_v54 = vmul.f32 0.5, %v1382_v35  ;;  %v2998_v34 = vld [vmem:[%s4222_s2 + $0xa] ss:$0 sm:$0xff] }
 0xa35   :  { %v1391_v39 = vmul.f32 %v1389_v37, %v1379_v29  ;;  %v1390_v41 = vmul.f32 %v1388_v38, %v1382_v35 }
 0xa37   :  { %v1393_v42 = vadd.f32 %v1391_v39, %v1379_v29  ;;  %v1392_v45 = vmul.f32 %v1390_v41, %v1382_v35 }
 0xa39   :  { %v1395_v47 = vmul.f32 0.7978846, %v1393_v42  ;;  %v1394_v48 = vadd.f32 %v1392_v45, %v1382_v35 }
 0xa3b   :  { %3521 = vtanh.f32 %v1395_v47  ;;  %v1396_v49 = vmul.f32 0.7978846, %v1394_v48 }
 0xa3d   :  { %3523 = vtanh.f32 %v1396_v49 }
 0xa45   :  { %v3522_v50 = vpop.eup %3521 }
 0xa46   :  { %v1399_v51 = vadd.f32 1.0, %v3522_v50 }
 0xa47   :  { %v3524_v52 = vpop.eup %3523 }
 0xa48   :  { %v1400_v55 = vadd.f32 1.0, %v3524_v52  ;;  %v1401_v44 = vmul.f32 %v1399_v51, %v1385_v53 }
 0xa4a   :  { %v1402_v56 = vmul.f32 %v1400_v55, %v1386_v54 }
 0xa4c   :  { %v1403_v46 = vpack.c.bf16 %v1402_v56, %v1401_v44 }
 0xa4e   :  { %3300 = vmatmul.mubr.msk.bf16.vlgmr.msra.gmra.mrb[40].mxu0 %vm1440_vm4, %v1403_v46 }
 0xa4f   :  { %3319 = vmatprep.mubr.msk.bf16.mxu0 %vm3574_vm1, %v3573_v15 }
 0xb21   :  { %v1478_v57 = vpop.f32.mrb[40].mxu0 }
 0xb22   :  { %v1479_v58 = vadd.f32 %v2986_v40, %v1478_v57  ;;  %v3301_v59 = vpop.f32.mrb[41].mxu0 }
 0xb23   :  { %v1481_v60 = vpop.f32.mrb[42].mxu0 }
 0xb24   :  { %v1482_v43 = vadd.f32 %v2986_v40, %v1481_v60  ;;  %v3302_v61 = vpop.f32.mrb[43].mxu0  ;;  %v1485_v62 = vadd.f32 %v1479_v58, %v1318_v20 }
 0xb26   :  { %v1487_v63 = vsel %vm31_vm0, %v1485_v62, 0.0  ;;  %v1486_v31 = vadd.f32 %v1482_v43, %v1319_v21 }
 0xb27   :  { %1488 = vadd.xlane.f32.xlu0 %v1487_v63 }
 0xb28   :  { %v1490_v0 = vsel %vm31_vm0, %v1486_v31, 0.0 }
 0xb29   :  { %1491 = vadd.xlane.f32.xlu1 %v1490_v0 }
 0xbb4   :  { %v1489_v32 = vpop.xlane.xlu0 %1488 }
 0xbb5   :  { %v1493_v1 = vmul.f32 0.03125, %v1489_v32 }
 0xbb6   :  { %v1492_v2 = vpop.xlane.xlu1 %1491 }
 0xbb7   :  { %v1495_v3 = vsub.f32 %v1485_v62, %v1493_v1  ;;  %v1494_v4 = vmul.f32 0.03125, %v1492_v2 }
 0xbb9   :  { %v1496_v5 = vsub.f32 %v1486_v31, %v1494_v4  ;;  %v1497_v6 = vmul.f32 %v1495_v3, %v1495_v3 }
 0xbbb   :  { %v1499_v7 = vsel %vm31_vm0, %v1497_v6, 0.0  ;;  %v1498_v8 = vmul.f32 %v1496_v5, %v1496_v5 }
 0xbbc   :  { %1500 = vadd.xlane.f32.xlu0 %v1499_v7 }
 0xbbd   :  { %v1502_v9 = vsel %vm31_vm0, %v1498_v8, 0.0 }
 0xbbe   :  { %1503 = vadd.xlane.f32.xlu1 %v1502_v9 }
 0xc49   :  { %v1501_v14 = vpop.xlane.xlu0 %1500 }
 0xc4a   :  { %v1505_v16 = vmul.f32 0.03125, %v1501_v14 }
 0xc4b   :  { %v1504_v17 = vpop.xlane.xlu1 %1503 }
 0xc4c   :  { %v1507_v18 = vadd.f32 1e-12, %v1505_v16  ;;  %v1506_v19 = vmul.f32 0.03125, %v1504_v17 }
 0xc4e   :  { %3525 = vrsqrt.f32 %v1507_v18  ;;  %v1508_v20 = vadd.f32 1e-12, %v1506_v19 }
 0xc50   :  { %3527 = vrsqrt.f32 %v1508_v20 }
 0xc58   :  { %v3526_v21 = vpop.eup %3525 }
 0xc59   :  { %v1511_v23 = vmul.f32 %v3526_v21, %v1495_v3 }
 0xc5a   :  { %v3528_v24 = vpop.eup %3527 }
 0xc5b   :  { %v1517_v25 = vmul.f32 %v2992_v22, %v1511_v23  ;;  %v1512_v26 = vmul.f32 %v3528_v24, %v1496_v5 }
 0xc5d   :  { %v1518_v28 = vmul.f32 %v2992_v22, %v1512_v26  ;;  %v3945_v29 = vadd.f32 %v2993_v27, %v1517_v25 }
 0xc5f   :  { %v3947_v30 = vadd.f32 %v2993_v27, %v1518_v28 }
 0xc61   :  { %v1533_v33 = vpack.c.bf16 %v3947_v30, %v3945_v29 }
 0xc63   :  { %3308 = vmatmul.mubr.msk.bf16.vlgmr.msra.gmra.mrb[48].mxu1 %vm31_vm0, %v1533_v33 }
 0xc64   :  { %3313 = vmatprep.mubr.msk.bf16.mxu1 %vm3574_vm1, %v3573_v15 }
 0xd36   :  { %v1592_v35 = vpop.f32.mrb[48].mxu1 }
 0xd37   :  { %v1593_v36 = vadd.f32 %v2998_v34, %v1592_v35  ;;  %v3309_v37 = vpop.f32.mrb[49].mxu1 }
 0xd38   :  { %v1595_v38 = vpop.f32.mrb[50].mxu1 }
 0xd39   :  { %v1599_v39 = vmul.f32 0.35355338, %v1593_v36  ;;  %v3957_v41 = vpack.c.bf16 %v1593_v36, %v1593_v36  ;;  %v1596_v42 = vadd.f32 %v2998_v34, %v1595_v38  ;;  %v3310_v45 = vpop.f32.mrb[51].mxu1 }
 0xd3b   :  { %v3959_v47 = vpack.c.bf16 %v1596_v42, %v1596_v42  ;;  %1606 = vrot.lane.b32.xlu0 %v3957_v41, %s3575_s14  ;;  %v3963_v48 = vpack.c.bf16 %v1599_v39, %v1599_v39  ;;  %v1600_v49 = vmul.f32 0.35355338, %v1596_v42 }
 0xd3d   :  { %1655 = vrot.lane.b32.xlu1 %v3959_v47, %s3575_s14  ;;  %v3975_v50 = vpack.c.bf16 %v1600_v49, %v1600_v49 }
 0xd3f   :  { %1704 = vrot.lane.b32.xlu0 %v3963_v48, %s3576_s15 }
 0xd41   :  { %1706 = vrot.lane.b32.xlu1 %v3957_v41, %s3577_s16 }
 0xd43   :  { %1807 = vrot.lane.b32.xlu0 %v3957_v41, %s3578_s17 }
 0xd45   :  { %1757 = vrot.lane.b32.xlu1 %v3959_v47, %s3577_s16 }
 0xd47   :  { %1805 = vrot.lane.b32.xlu0 %v3963_v48, %s3579_s18 }
 0xd49   :  { %1755 = vrot.lane.b32.xlu1 %v3975_v50, %s3576_s15 }
 0xd4d   :  { %1857 = vrot.lane.b32.xlu1 %v3959_v47, %s3578_s17 }
 0xd51   :  { %1855 = vrot.lane.b32.xlu1 %v3975_v50, %s3579_s18 }
 0xdad   :  { %v1607_v51 = vpop.permute.xlu0 %1606 }
 0xdae   :  { %v1612_v52 = vsel %vm187_vm2, %v1607_v51, 0 }
 0xdaf   :  { %3312 = vmatpush3.bf16.xpose.msra.mxu1 %v1612_v52  ;;  %v1656_v53 = vpop.permute.xlu1 %1655 }
 0xdb0   :  { %v1661_v54 = vsel %vm187_vm2, %v1656_v53, 0  ;;  %3323 = vmatprep.subr.bf16.mxu1 %v3573_v15 }
 0xdb1   :  { %3318 = vmatpush3.bf16.xpose.msra.mxu0 %v1661_v54  ;;  %v1705_v44 = vpop.permute.xlu0 %1704 }
 0xdb2   :  { %3329 = vmatprep.subr.bf16.mxu0 %v3573_v15 }
 0xdb3   :  { %v1707_v55 = vpop.permute.xlu1 %1706 }
 0xdb4   :  { %v1712_v56 = vsel %vm187_vm2, %v1707_v55, 0 }
 0xdb5   :  { %v1808_v57 = vpop.permute.xlu0 %1807 }
 0xdb6   :  { %3314 = vmatmul.mubr.msk.bf16.vlgmr.msra.gmra.mrb[52].mxu1 %vm187_vm2, %v3963_v48  ;;  %v1813_v59 = vsel %vm187_vm2, %v1808_v57, 0 }
 0xdb7   :  { %3324 = vmatpush3.bf16.xpose.msra.mxu1 %v1712_v56  ;;  %v1758_v46 = vpop.permute.xlu1 %1757  ;;  %3325 = vmatprep.mubr.msk.bf16.mxu1 %vm3574_vm1, %v3573_v15 }
 0xdb8   :  { %v1763_v40 = vsel %vm187_vm2, %v1758_v46, 0  ;;  %3320 = vmatmul.mubr.msk.bf16.vlgmr.msra.gmra.mrb[44].mxu0 %vm187_vm2, %v3975_v50  ;;  %3335 = vmatprep.subr.bf16.mxu1 %v3573_v15 }
 0xdb9   :  { %3330 = vmatpush3.bf16.xpose.msra.mxu0 %v1763_v40  ;;  %3331 = vmatprep.mubr.msk.bf16.mxu0 %vm3574_vm1, %v3573_v15  ;;  %v1806_v61 = vpop.permute.xlu0 %1805 }
 0xdba   :  { %3341 = vmatprep.subr.bf16.mxu0 %v3573_v15 }
 0xdbb   :  { %v1756_v58 = vpop.permute.xlu1 %1755 }
 0xdbe   :  { %3326 = vmatmul.mubr.msk.bf16.vlgmr.msra.gmra.mrb[56].mxu1 %vm187_vm2, %v1705_v44 }
 0xdbf   :  { %3336 = vmatpush3.bf16.xpose.msra.mxu1 %v1813_v59  ;;  %v1858_v60 = vpop.permute.xlu1 %1857  ;;  %3337 = vmatprep.mubr.msk.bf16.mxu1 %vm3574_vm1, %v3573_v15 }
 0xdc0   :  { %v1863_v43 = vsel %vm187_vm2, %v1858_v60, 0  ;;  %3332 = vmatmul.mubr.msk.bf16.vlgmr.msra.gmra.mrb[48].mxu0 %vm187_vm2, %v1756_v58  ;;  %3347 = vmatprep.subr.bf16.mxu1 %v3573_v15 }
 0xdc1   :  { %3342 = vmatpush3.bf16.xpose.msra.mxu0 %v1863_v43  ;;  %3343 = vmatprep.mubr.msk.bf16.mxu0 %vm3574_vm1, %v3573_v15 }
 0xdc2   :  { %3353 = vmatprep.subr.bf16.mxu0 %v3573_v15 }
 0xdc3   :  { %v1856_v62 = vpop.permute.xlu1 %1855 }
 0xdc6   :  { %3338 = vmatmul.mubr.msk.bf16.vlgmr.msra.gmra.mrb[60].mxu1 %vm187_vm2, %v1806_v61 }
 0xdc7   :  { %3349 = vmatprep.mubr.msk.bf16.mxu1 %vm3574_vm1, %v3573_v15 }
 0xdc8   :  { %3344 = vmatmul.mubr.msk.bf16.vlgmr.msra.gmra.mrb[52].mxu0 %vm187_vm2, %v1856_v62 }
 0xdc9   :  { %3355 = vmatprep.mubr.msk.bf16.mxu0 %vm3574_vm1, %v3573_v15 }
 0xe89   :  { %v1648_v63 = vpop.f32.mrb[52].mxu1 }
 0xe8a   :  { %v2005_v31 = vadd.f32 %v1648_v63, %v3732_v10  ;;  %v3315_v0 = vpop.f32.mrb[53].mxu1 }
 0xe8b   :  { %v1651_v32 = vpop.f32.mrb[54].mxu1  ;;  %v1697_v1 = vpop.f32.mrb[44].mxu0 }
 0xe8c   :  { %v2006_v2 = vadd.f32 %v1697_v1, %v3734_v11  ;;  %v3316_v3 = vpop.f32.mrb[55].mxu1  ;;  %v3321_v4 = vpop.f32.mrb[45].mxu0  ;;  %v2013_v5 = vsel %vm187_vm2, %v2005_v31, -inf }
 0xe8d   :  { %v1700_v6 = vpop.f32.mrb[46].mxu0  ;;  %2014 = vmax.xlane.f32.xlu0 %v2013_v5 }
 0xe8e   :  { %v3322_v7 = vpop.f32.mrb[47].mxu0  ;;  %v2016_v8 = vsel %vm187_vm2, %v2006_v2, -inf }
 0xe8f   :  { %2017 = vmax.xlane.f32.xlu1 %v2016_v8 }
 0xe91   :  { %v1748_v9 = vpop.f32.mrb[56].mxu1 }
 0xe92   :  { %v2007_v12 = vadd.f32 %v1748_v9, %v3732_v10  ;;  %v3327_v13 = vpop.f32.mrb[57].mxu1 }
 0xe93   :  { %v1751_v14 = vpop.f32.mrb[58].mxu1  ;;  %v1799_v16 = vpop.f32.mrb[48].mxu0 }
 0xe94   :  { %v2008_v17 = vadd.f32 %v1799_v16, %v3734_v11  ;;  %v3328_v18 = vpop.f32.mrb[59].mxu1  ;;  %v3333_v19 = vpop.f32.mrb[49].mxu0  ;;  %v2019_v20 = vsel %vm187_vm2, %v2007_v12, -inf }
 0xe95   :  { %v1802_v21 = vpop.f32.mrb[50].mxu0  ;;  %2020 = vmax.xlane.f32.xlu0 %v2019_v20 }
 0xe96   :  { %v3334_v22 = vpop.f32.mrb[51].mxu0  ;;  %v2022_v23 = vsel %vm187_vm2, %v2008_v17, -inf }
 0xe99   :  { %2023 = vmax.xlane.f32.xlu0 %v2022_v23  ;;  %v4025_v24 = vpop.f32.mrb[60].mxu1 }
 0xe9a   :  { %v3339_v25 = vpop.f32.mrb[61].mxu1 }
 0xe9b   :  { %v1852_v26 = vpop.f32.mrb[62].mxu1  ;;  %v4027_v27 = vpop.f32.mrb[52].mxu0 }
 0xe9c   :  { %v3340_v28 = vpop.f32.mrb[63].mxu1  ;;  %v3345_v33 = vpop.f32.mrb[53].mxu0  ;;  %v2010_v3 = vadd.f32 %v4027_v27, %v3734_v11 }
 0xe9d   :  { %v1902_v34 = vpop.f32.mrb[54].mxu0 }
 0xe9e   :  { %v3346_v35 = vpop.f32.mrb[55].mxu0  ;;  %v2028_v5 = vsel %vm187_vm2, %v2010_v3, -inf }
 0xea0   :  { %1957 = vrot.lane.b32.xlu1 %v3959_v47, %s3581_s1 }
 0xea4   :  { %1905 = vrot.lane.b32.xlu1 %v3963_v48, %s3582_s21 }
 0xea8   :  { %1955 = vrot.lane.b32.xlu1 %v3975_v50, %s3582_s21 }
 0xeac   :  { %2157 = vrot.lane.b32.xlu1 %v3959_v47, %s3583_s22 }
 0xeaf   :  { %1907 = vrot.lane.b32.xlu0 %v3957_v41, %s3581_s1 }
 0xeb3   :  { %2109 = vrot.lane.b32.xlu0 %v3957_v41, %s3583_s22 }
 0xf1a   :  { %v2015_v36 = vpop.xlane.xlu0 %2014 }
 0xf1b   :  { %v2037_v37 = vsub.f32 %v2005_v31, %v2015_v36 }
 0xf1c   :  { %v2018_v38 = vpop.xlane.xlu1 %2017 }
 0xf1d   :  { %v2045_v39 = vmul.f32 1.442695, %v2037_v37  ;;  %v2038_v42 = vsub.f32 %v2006_v2, %v2018_v38  ;;  %v2009_v2 = vadd.f32 %v4025_v24, %v3732_v10 }
 0xf1f   :  { %3529 = vpow2.f32 %v2045_v39  ;;  %v2047_v45 = vmul.f32 1.442695, %v2038_v42  ;;  %v2025_v4 = vsel %vm187_vm2, %v2009_v2, -inf }
 0xf20   :  { %v1958_v48 = vpop.permute.xlu1 %1957 }
 0xf21   :  { %3531 = vpow2.f32 %v2047_v45  ;;  %v1963_v49 = vsel %vm187_vm2, %v1958_v48, 0 }
 0xf22   :  { %3354 = vmatpush3.bf16.xpose.msra.mxu0 %v1963_v49  ;;  %v2021_v50 = vpop.xlane.xlu0 %2020 }
 0xf23   :  { %v2039_v51 = vsub.f32 %v2007_v12, %v2021_v50  ;;  %3365 = vmatprep.subr.bf16.mxu0 %v3573_v15 }
 0xf24   :  { %v1906_v52 = vpop.permute.xlu1 %1905 }
 0xf25   :  { %v2049_v53 = vmul.f32 1.442695, %v2039_v51 }
 0xf26   :  { %v2024_v54 = vpop.xlane.xlu0 %2023 }
 0xf27   :  { %3533 = vpow2.f32 %v2049_v53  ;;  %v2040_v55 = vsub.f32 %v2008_v17, %v2024_v54 }
 0xf28   :  { %v1956_v44 = vpop.permute.xlu1 %1955 }
 0xf29   :  { %v3530_v56 = vpop.eup %3529  ;;  %v2051_v46 = vmul.f32 1.442695, %v2040_v55  ;;  %3356 = vmatmul.mubr.msk.bf16.vlgmr.msra.gmra.mrb[56].mxu0 %vm187_vm2, %v1956_v44 }
 0xf2a   :  { %v1908_v40 = vpop.permute.xlu0 %1907  ;;  %v2061_v57 = vsel %vm187_vm2, %v3530_v56, 0.0  ;;  %3367 = vmatprep.mubr.msk.bf16.mxu0 %vm3574_vm1, %v3573_v15 }
 0xf2b   :  { %v3532_v58 = vpop.eup %3531  ;;  %3535 = vpow2.f32 %v2051_v46  ;;  %v1913_v59 = vsel %vm187_vm2, %v1908_v40, 0  ;;  %2062 = vadd.xlane.f32.xlu0 %v2061_v57  ;;  %v3012_v40 = vld [vmem:[%s4224_s4 + $0x10] sm:$0xf] }
 0xf2c   :  { %v2158_v60 = vpop.permute.xlu1 %2157  ;;  %3348 = vmatpush3.bf16.xpose.msra.mxu1 %v1913_v59  ;;  %v2064_v43 = vsel %vm187_vm2, %v3532_v58, 0.0  ;;  %v2357_v57 = vsel %vm694_vm3, %v3012_v40, 0 }
 0xf2d   :  { %v2163_v61 = vsel %vm694_vm3, %v2158_v60, 0  ;;  %2065 = vadd.xlane.f32.xlu1 %v2064_v43  ;;  %3359 = vmatprep.subr.bf16.mxu1 %v3573_v15 }
 0xf2e   :  { %3366 = vmatpush3.bf16.msra.mxu0 %v2163_v61  ;;  %v2110_v62 = vpop.permute.xlu0 %2109 }
 0xf2f   :  { %3377 = vmatprep.subr.bf16.mxu0 %v3573_v15  ;;  %v2115_v0 = vsel %vm694_vm3, %v2110_v62, 0 }
 0xf31   :  { %v3534_v63 = vpop.eup %3533 }
 0xf32   :  { %v2067_v31 = vsel %vm187_vm2, %v3534_v63, 0.0 }
 0xf33   :  { %2068 = vadd.xlane.f32.xlu0 %v2067_v31  ;;  %3350 = vmatmul.mubr.msk.bf16.vlgmr.msra.gmra.mrb[64].mxu1 %vm187_vm2, %v1906_v52 }
 0xf34   :  { %3360 = vmatpush3.bf16.msra.mxu1 %v2115_v0  ;;  %3361 = vmatprep.mubr.msk.bf16.mxu1 %vm3574_vm1, %v3573_v15 }
 0xf35   :  { %v3536_v32 = vpop.eup %3535  ;;  %3371 = vmatprep.subr.bf16.mxu1 %v3573_v15 }
 0xf36   :  { %v2070_v1 = vsel %vm187_vm2, %v3536_v32, 0.0 }
 0xf37   :  { %2071 = vadd.xlane.f32.xlu1 %v2070_v1 }
 0xf48   :  { %2256 = vrot.lane.b32.xlu1 %v3959_v47, %s3584_s23 }
 0xf49   :  { %2208 = vrot.lane.b32.xlu0 %v3957_v41, %s3584_s23 }
 0xf68   :  { %2026 = vmax.xlane.f32.xlu0 %v2025_v4 }
 0xf6c   :  { %2029 = vmax.xlane.f32.xlu1 %v2028_v5 }
 0xf7d   :  { %2448 = vrot.lane.b32.xlu1 %v3959_v47, %s3585_s24 }
 0xfb8   :  { %v2063_v6 = vpop.xlane.xlu0 %2062 }
 0xfb9   :  { %3537 = vrcp.f32 %v2063_v6 }
 0xfba   :  { %v2066_v7 = vpop.xlane.xlu1 %2065 }
 0xfbb   :  { %3539 = vrcp.f32 %v2066_v7 }
 0xfc0   :  { %v2069_v8 = vpop.xlane.xlu0 %2068 }
 0xfc1   :  { %3541 = vrcp.f32 %v2069_v8 }
 0xfc3   :  { %v3538_v9 = vpop.eup %3537 }
 0xfc4   :  { %v2086_v12 = vmul.f32 %v3538_v9, %v3530_v56  ;;  %v2072_v13 = vpop.xlane.xlu1 %2071  ;;  %v2209_v16 = vpop.permute.xlu0 %2208 }
 0xfc5   :  { %v3540_v14 = vpop.eup %3539  ;;  %3543 = vrcp.f32 %v2072_v13  ;;  %v2214_v19 = vsel %vm694_vm3, %v2209_v16, 0 }
 0xfc6   :  { %v2088_v17 = vmul.f32 %v3540_v14, %v3532_v58  ;;  %v2101_v18 = vpack.c.bf16 %v2086_v12, %v2086_v12 }
 0xfc8   :  { %v2257_v20 = vpop.permute.xlu1 %2256  ;;  %3362 = vmatmul.mubr.msk.bf16.vlgmr.msra.gmra.mrb[68].mxu1 %vm187_vm2, %v2101_v18  ;;  %v2102_v21 = vpack.c.bf16 %v2088_v17, %v2088_v17 }
 0xfc9   :  { %v2262_v22 = vsel %vm694_vm3, %v2257_v20, 0  ;;  %3372 = vmatpush3.bf16.msra.mxu1 %v2214_v19  ;;  %3373 = vmatprep.mubr.msk.bf16.mxu1 %vm3574_vm1, %v3573_v15 }
 0xfca   :  { %3368 = vmatmul.mubr.msk.bf16.vlgmr.msra.gmra.mrb[60].mxu0 %vm187_vm2, %v2102_v21  ;;  %3383 = vmatprep.subr.bf16.mxu1 %v3573_v15 }
 0xfcb   :  { %v3542_v23 = vpop.eup %3541  ;;  %3378 = vmatpush3.bf16.msra.mxu0 %v2262_v22  ;;  %3379 = vmatprep.mubr.msk.bf16.mxu0 %vm3574_vm1, %v3573_v15 }
 0xfcc   :  { %v2090_v24 = vmul.f32 %v3542_v23, %v3534_v63  ;;  %3389 = vmatprep.subr.bf16.mxu0 %v3573_v15 }
 0xfce   :  { %v2103_v25 = vpack.c.bf16 %v2090_v24, %v2090_v24 }
 0xfcf   :  { %v3544_v26 = vpop.eup %3543 }
 0xfd0   :  { %v2092_v27 = vmul.f32 %v3544_v26, %v3536_v32  ;;  %3374 = vmatmul.mubr.msk.bf16.vlgmr.msra.gmra.mrb[72].mxu1 %vm187_vm2, %v2103_v25 }
 0xfd1   :  { %3385 = vmatprep.mubr.msk.bf16.mxu1 %vm3574_vm1, %v3573_v15 }
 0xfd2   :  { %v2104_v28 = vpack.c.bf16 %v2092_v27, %v2092_v27 }
 0xfd4   :  { %3380 = vmatmul.mubr.msk.bf16.vlgmr.msra.gmra.mrb[64].mxu0 %vm187_vm2, %v2104_v28 }
 0xfd5   :  { %3391 = vmatprep.mubr.msk.bf16.mxu0 %vm3574_vm1, %v3573_v15  ;;  %3390 = vmatpush3.bf16.msra.mxu0 %v2357_v57 }
 0xfd6   :  { %3401 = vmatprep.subr.bf16.mxu0 %v3573_v15 }
 0xff5   :  { %v2027_v33 = vpop.xlane.xlu0 %2026 }
 0xff6   :  { %v2041_v34 = vsub.f32 %v2009_v2, %v2027_v33 }
 0xff8   :  { %v2053_v35 = vmul.f32 1.442695, %v2041_v34 }
 0xff9   :  { %v2030_v36 = vpop.xlane.xlu1 %2029 }
 0xffa   :  { %3545 = vpow2.f32 %v2053_v35  ;;  %v2042_v37 = vsub.f32 %v2010_v3, %v2030_v36 }
 0xffc   :  { %v2055_v38 = vmul.f32 1.442695, %v2042_v37  ;;  %v1999_v39 = vpop.f32.mrb[56].mxu0 }
 0xffd   :  { %v3357_v42 = vpop.f32.mrb[57].mxu0  ;;  %v2012_v59 = vadd.f32 %v1999_v39, %v3734_v11  ;;  %v2449_v43 = vpop.permute.xlu1 %2448 }
 0xffe   :  { %3547 = vpow2.f32 %v2055_v38  ;;  %v2002_v45 = vpop.f32.mrb[58].mxu0  ;;  %v2454_v7 = vsel %vm694_vm3, %v2449_v43, 0  ;;  %v3020_v42 = vld [vmem:[%s4224_s4 + $0x18] sm:$0xf] }
 0xfff   :  { %v3358_v48 = vpop.f32.mrb[59].mxu0  ;;  %v2034_v60 = vsel %vm187_vm2, %v2012_v59, -inf  ;;  %v2502_v45 = vsel %vm694_vm3, %v3020_v42, 0 }
0x1004   :  { %v4087_v49 = vpop.eup %3545 }
0x1005   :  { %v2073_v50 = vsel %vm187_vm2, %v4087_v49, 0.0 }
0x1006   :  { %2074 = vadd.xlane.f32.xlu0 %v2073_v50  ;;  %v1949_v51 = vpop.f32.mrb[64].mxu1 }
0x1007   :  { %v2011_v52 = vadd.f32 %v1949_v51, %v3732_v10  ;;  %v3351_v53 = vpop.f32.mrb[65].mxu1  ;;  %v3015_v10 = vld [vmem:[%s4224_s4 + $0x14] sm:$0xf] }
0x1008   :  { %v3548_v54 = vpop.eup %3547  ;;  %v1952_v55 = vpop.f32.mrb[66].mxu1  ;;  %v2310_v58 = vsel %vm694_vm3, %v3015_v10, 0 }
0x1009   :  { %v3352_v44 = vpop.f32.mrb[67].mxu1  ;;  %v2076_v56 = vsel %vm187_vm2, %v3548_v54, 0.0  ;;  %v2031_v46 = vsel %vm187_vm2, %v2011_v52, -inf  ;;  %3384 = vmatpush3.bf16.msra.mxu1 %v2310_v58 }
0x100a   :  { %2077 = vadd.xlane.f32.xlu0 %v2076_v56  ;;  %2032 = vmax.xlane.f32.xlu1 %v2031_v46 }
0x100b   :  { %3395 = vmatprep.subr.bf16.mxu1 %v3573_v15 }
0x1020   :  { %2400 = vrot.lane.b32.xlu0 %v3957_v41, %s3585_s24 }
0x103f   :  { %2035 = vmax.xlane.f32.xlu0 %v2034_v60 }
0x1093   :  { %v2075_v61 = vpop.xlane.xlu0 %2074 }
0x1097   :  { %v2078_v62 = vpop.xlane.xlu0 %2077  ;;  %v2033_v63 = vpop.xlane.xlu1 %2032 }
0x1098   :  { %3549 = vrcp.f32 %v2078_v62  ;;  %v2043_v31 = vsub.f32 %v2011_v52, %v2033_v63 }
0x109a   :  { %v2057_v0 = vmul.f32 1.442695, %v2043_v31 }
0x109b   :  { %v2151_v32 = vpop.f32.mrb[68].mxu1  ;;  %v2401_v20 = vpop.permute.xlu0 %2400 }
0x109c   :  { %3551 = vpow2.f32 %v2057_v0  ;;  %v3363_v1 = vpop.f32.mrb[69].mxu1  ;;  %v2406_v27 = vsel %vm694_vm3, %v2401_v20, 0 }
0x109d   :  { %v2154_v2 = vpop.f32.mrb[70].mxu1  ;;  %v2199_v3 = vpop.f32.mrb[60].mxu0  ;;  %3553 = vrcp.f32 %v2075_v61 }
0x109e   :  { %v2205_v4 = vpack.c.bf16 %v2199_v3, %v2151_v32  ;;  %v3364_v5 = vpop.f32.mrb[71].mxu1  ;;  %v3369_v6 = vpop.f32.mrb[61].mxu0 }
0x109f   :  { %v2202_v11 = vpop.f32.mrb[62].mxu0  ;;  %v3024_v6 = vld [vmem:[%s4224_s4 + $0x1c] sm:$0xf] }
0x10a0   :  { %v3370_v8 = vpop.f32.mrb[63].mxu0  ;;  %3392 = vmatmul.mubr.msk.bf16.vlgmr.msra.gmra.mrb[68].mxu0 %vm187_vm2, %v2205_v4  ;;  %v2649_v11 = vsel %vm694_vm3, %v3024_v6, 0  ;;  %v3033_v6 = vld [vmem:[%s4222_s2 + $0xe] ss:$0 sm:$0xff] }
0x10a1   :  { %3402 = vmatpush3.bf16.msra.mxu0 %v2454_v7  ;;  %3403 = vmatprep.mubr.msk.bf16.mxu0 %vm3574_vm1, %v3573_v15 }
0x10a2   :  { %v3550_v9 = vpop.eup %3549  ;;  %3413 = vmatprep.subr.bf16.mxu0 %v3573_v15 }
0x10a3   :  { %v2096_v12 = vmul.f32 %v3550_v9, %v3548_v54  ;;  %v2250_v13 = vpop.f32.mrb[72].mxu1 }
0x10a4   :  { %v3375_v14 = vpop.f32.mrb[73].mxu1 }
0x10a5   :  { %v2253_v16 = vpop.f32.mrb[74].mxu1  ;;  %v2106_v17 = vpack.c.bf16 %v2096_v12, %v2096_v12 }
0x10a6   :  { %v3552_v18 = vpop.eup %3551  ;;  %v3376_v19 = vpop.f32.mrb[75].mxu1 }
0x10a7   :  { %v2298_v21 = vpop.f32.mrb[64].mxu0  ;;  %v2079_v22 = vsel %vm187_vm2, %v3552_v18, 0.0  ;;  %v3554_v25 = vpop.eup %3553 }
0x10a8   :  { %v2304_v23 = vpack.c.bf16 %v2298_v21, %v2250_v13  ;;  %v3381_v24 = vpop.f32.mrb[65].mxu0  ;;  %2080 = vadd.xlane.f32.xlu0 %v2079_v22  ;;  %3404 = vmatmul.mubr.msk.bf16.vlgmr.msra.gmra.mrb[72].mxu0 %vm187_vm2, %v2106_v17  ;;  %v2094_v33 = vmul.f32 %v3554_v25, %v4087_v49 }
0x10a9   :  { %v2301_v26 = vpop.f32.mrb[66].mxu0  ;;  %3415 = vmatprep.mubr.msk.bf16.mxu0 %vm3574_vm1, %v3573_v15 }
0x10aa   :  { %v3382_v28 = vpop.f32.mrb[67].mxu0  ;;  %3386 = vmatmul.mubr.msk.bf16.vlgmr.msra.gmra.mrb[76].mxu1 %vm187_vm2, %v2304_v23  ;;  %v2105_v34 = vpack.c.bf16 %v2094_v33, %v2094_v33  ;;  %v3026_v33 = vld [vmem:[%s4222_s2 + $0xb] ss:$0 sm:$0xff] }
0x10ab   :  { %3396 = vmatpush3.bf16.msra.mxu1 %v2406_v27  ;;  %3397 = vmatprep.mubr.msk.bf16.mxu1 %vm3574_vm1, %v3573_v15 }
0x10ac   :  { %3407 = vmatprep.subr.bf16.mxu1 %v3573_v15 }
0x10b2   :  { %3398 = vmatmul.mubr.msk.bf16.vlgmr.msra.gmra.mrb[80].mxu1 %vm187_vm2, %v2105_v34 }
0x10b3   :  { %3409 = vmatprep.mubr.msk.bf16.mxu1 %vm3574_vm1, %v3573_v15  ;;  %3408 = vmatpush3.bf16.msra.mxu1 %v2502_v45 }
0x10b4   :  { %3419 = vmatprep.subr.bf16.mxu1 %v3573_v15 }
0x10be   :  { %2547 = vrot.lane.b32.xlu0 %v3957_v41, %s3586_s28 }
0x10cc   :  { %v2036_v35 = vpop.xlane.xlu0 %2035 }
0x10cd   :  { %v2044_v36 = vsub.f32 %v2012_v59, %v2036_v35 }
0x10cf   :  { %v2059_v37 = vmul.f32 1.442695, %v2044_v36 }
0x10d1   :  { %3555 = vpow2.f32 %v2059_v37 }
0x10db   :  { %v3556_v38 = vpop.eup %3555 }
0x10dc   :  { %v2082_v39 = vsel %vm187_vm2, %v3556_v38, 0.0 }
0x10dd   :  { %2083 = vadd.xlane.f32.xlu1 %v2082_v39 }
0x10ee   :  { %2595 = vrot.lane.b32.xlu1 %v3959_v47, %s3586_s28 }
0x1135   :  { %v2081_v41 = vpop.xlane.xlu0 %2080 }
0x1136   :  { %3557 = vrcp.f32 %v2081_v41 }
0x1139   :  { %v2548_v48 = vpop.permute.xlu0 %2547 }
0x113a   :  { %v2553_v49 = vsel %vm694_vm3, %v2548_v48, 0 }
0x113b   :  { %3414 = vmatpush3.bf16.msra.mxu0 %v2553_v49 }
0x113c   :  { %3425 = vmatprep.subr.bf16.mxu0 %v3573_v15 }
0x1140   :  { %v3558_v50 = vpop.eup %3557 }
0x1141   :  { %v2098_v51 = vmul.f32 %v3558_v50, %v3552_v18 }
0x1143   :  { %v2107_v47 = vpack.c.bf16 %v2098_v51, %v2098_v51 }
0x1145   :  { %3416 = vmatmul.mubr.msk.bf16.vlgmr.msra.gmra.mrb[76].mxu0 %vm187_vm2, %v2107_v47 }
0x1146   :  { %3427 = vmatprep.mubr.msk.bf16.mxu0 %vm3574_vm1, %v3573_v15  ;;  %3426 = vmatpush3.bf16.msra.mxu0 %v2649_v11 }
0x1147   :  { %3439 = vmatprep.subr.bf16.mxu0 %v3573_v15 }
0x116a   :  { %v2084_v44 = vpop.xlane.xlu1 %2083 }
0x116b   :  { %3559 = vrcp.f32 %v2084_v44 }
0x116e   :  { %v2596_v62 = vpop.permute.xlu1 %2595 }
0x116f   :  { %v2601_v2 = vsel %vm694_vm3, %v2596_v62, 0 }
0x1173   :  { %v2393_v52 = vpop.f32.mrb[68].mxu0 }
0x1174   :  { %v3393_v53 = vpop.f32.mrb[69].mxu0 }
0x1175   :  { %v2396_v54 = vpop.f32.mrb[70].mxu0  ;;  %v3560_v32 = vpop.eup %3559 }
0x1176   :  { %v3394_v55 = vpop.f32.mrb[71].mxu0  ;;  %v2100_v4 = vmul.f32 %v3560_v32, %v3556_v38 }
0x1177   :  { %v3476_v55 = vld [vmem:[%s4225_s5 + $0x18] sm:$0xff]  }
0x1178   :  { %v2108_v5 = vpack.c.bf16 %v2100_v4, %v2100_v4  ;;  %v3479_v4 = vld [vmem:[%s4226_s6 + $0x30] sm:$0xff]  }
0x117b   :  { %v2490_v56 = vpop.f32.mrb[72].mxu0 }
0x117c   :  { %v3405_v46 = vpop.f32.mrb[73].mxu0 }
0x117d   :  { %v2346_v40 = vpop.f32.mrb[76].mxu1  ;;  %v2493_v57 = vpop.f32.mrb[74].mxu0 }
0x117e   :  { %v2394_v10 = vadd.f32 %v2393_v52, %v2346_v40  ;;  %v3387_v58 = vpop.f32.mrb[77].mxu1  ;;  %v3406_v59 = vpop.f32.mrb[75].mxu0 }
0x117f   :  { %v2349_v60 = vpop.f32.mrb[78].mxu1  ;;  %v3027_v59 = vld [vmem:[%s4222_s2 + $0xc] ss:$0 sm:$0xff] }
0x1180   :  { %v2397_v43 = vadd.f32 %v2396_v54, %v2349_v60  ;;  %v3388_v61 = vpop.f32.mrb[79].mxu1  ;;  %v3475_v54 = vld [vmem:[%s4225_s5 + $0x10] sm:$0xff]  }
0x1185   :  { %v2442_v63 = vpop.f32.mrb[80].mxu1 }
0x1186   :  { %v2496_v31 = vpack.c.bf16 %v2490_v56, %v2442_v63  ;;  %v3399_v0 = vpop.f32.mrb[81].mxu1  ;;  %v3028_v63 = vld [vmem:[%s4222_s2 + $0xd] ss:$0 sm:$0xff] }
0x1187   :  { %v2445_v1 = vpop.f32.mrb[82].mxu1 }
0x1188   :  { %v3400_v3 = vpop.f32.mrb[83].mxu1  ;;  %3410 = vmatmul.mubr.msk.bf16.vlgmr.msra.gmra.mrb[84].mxu1 %vm187_vm2, %v2496_v31 }
0x1189   :  { %3420 = vmatpush3.bf16.msra.mxu1 %v2601_v2  ;;  %3421 = vmatprep.mubr.msk.bf16.mxu1 %vm3574_vm1, %v3573_v15  ;;  %v3477_v2 = vld [vmem:[%s4226_s6 + $0x20] sm:$0xff]   ;;  %v3478_v3 = vld [vmem:[%s4226_s6 + $0x28] sm:$0xff]  }
0x118a   :  { %3431 = vmatprep.subr.bf16.mxu1 %v3573_v15 }
0x1190   :  { %3422 = vmatmul.mubr.msk.bf16.vlgmr.msra.gmra.mrb[88].mxu1 %vm187_vm2, %v2108_v5  ;;  %v3480_v5 = vld [vmem:[%s4226_s6 + $0x38] sm:$0xff]  }
0x1191   :  { %3435 = vmatprep.mubr.msk.bf16.mxu1 %vm3574_vm1, %v3573_v15  ;;  %3432 = vmatpush3.bf16.msra.mxu1 %v3475_v54 }
0x1192   :  { %3433 = vmatprep.subr.bf16.mxu1 %v3573_v15 }
0x1195   :  { %3434 = vmatpush3.bf16.msra.mxu1 %v3476_v55 }
0x1218   :  { %v2589_v7 = vpop.f32.mrb[76].mxu0 }
0x1219   :  { %v3417_v8 = vpop.f32.mrb[77].mxu0 }
0x121a   :  { %v2592_v9 = vpop.f32.mrb[78].mxu0 }
0x121b   :  { %v3418_v12 = vpop.f32.mrb[79].mxu0 }
0x125b   :  { %v2538_v13 = vpop.f32.mrb[84].mxu1 }
0x125c   :  { %v2545_v14 = vadd.f32 %v2538_v13, %v2394_v10  ;;  %v3411_v16 = vpop.f32.mrb[85].mxu1 }
0x125d   :  { %v2541_v17 = vpop.f32.mrb[86].mxu1 }
0x125e   :  { %v2546_v18 = vadd.f32 %v2541_v17, %v2397_v43  ;;  %v3412_v19 = vpop.f32.mrb[87].mxu1 }
0x1263   :  { %v2637_v20 = vpop.f32.mrb[88].mxu1 }
0x1264   :  { %v2643_v21 = vpack.c.bf16 %v2637_v20, %v2589_v7  ;;  %v3423_v22 = vpop.f32.mrb[89].mxu1 }
0x1265   :  { %v2640_v23 = vpop.f32.mrb[90].mxu1 }
0x1266   :  { %v3424_v24 = vpop.f32.mrb[91].mxu1  ;;  %3428 = vmatmul.mubr.msk.bf16.vlgmr.msra.gmra.mrb[80].mxu0 %vm187_vm2, %v2643_v21 }
0x1267   :  { %3447 = vmatprep.mubr.msk.bf16.mxu0 %vm3574_vm1, %v3573_v15  ;;  %3440 = vmatpush3.bf16.msra.mxu0 %v3477_v2 }
0x1268   :  { %3441 = vmatprep.subr.bf16.mxu0 %v3573_v15 }
0x126b   :  { %3442 = vmatpush3.bf16.msra.mxu0 %v3478_v3 }
0x126c   :  { %3443 = vmatprep.subr.bf16.mxu0 %v3573_v15 }
0x126f   :  { %3444 = vmatpush3.bf16.msra.mxu0 %v3479_v4 }
0x1270   :  { %3445 = vmatprep.subr.bf16.mxu0 %v3573_v15 }
0x1273   :  { %3446 = vmatpush3.bf16.msra.mxu0 %v3480_v5 }
0x1339   :  { %v2685_v25 = vpop.f32.mrb[80].mxu0 }
0x133a   :  { %v2692_v26 = vadd.f32 %v2685_v25, %v2545_v14  ;;  %v3429_v27 = vpop.f32.mrb[81].mxu0 }
0x133b   :  { %v2688_v28 = vpop.f32.mrb[82].mxu0 }
0x133c   :  { %v2694_v34 = vadd.f32 %v2692_v26, %v3945_v29  ;;  %v2693_v35 = vadd.f32 %v2688_v28, %v2546_v18  ;;  %v3430_v36 = vpop.f32.mrb[83].mxu0 }
0x133e   :  { %v2695_v37 = vadd.f32 %v2693_v35, %v3947_v30  ;;  %v2700_v38 = vadd.f32 %v3026_v33, %v2694_v34 }
0x1340   :  { %v2702_v39 = vsel %vm31_vm0, %v2700_v38, 0.0  ;;  %v2701_v42 = vadd.f32 %v3026_v33, %v2695_v37  ;;  %v3045_v37 = vld [vmem:[%s4222_s2 + $0xf] ss:$0 sm:$0xff] }
0x1341   :  { %2703 = vadd.xlane.f32.xlu1 %v2702_v39 }
0x1342   :  { %v2705_v45 = vsel %vm31_vm0, %v2701_v42, 0.0 }
0x1343   :  { %2706 = vadd.xlane.f32.xlu0 %v2705_v45 }
0x13ce   :  { %v2704_v41 = vpop.xlane.xlu1 %2703 }
0x13cf   :  { %v2708_v48 = vmul.f32 0.03125, %v2704_v41 }
0x13d0   :  { %v2707_v49 = vpop.xlane.xlu0 %2706 }
0x13d1   :  { %v2710_v50 = vsub.f32 %v2700_v38, %v2708_v48  ;;  %v2709_v51 = vmul.f32 0.03125, %v2707_v49 }
0x13d3   :  { %v2711_v47 = vsub.f32 %v2701_v42, %v2709_v51  ;;  %v2712_v52 = vmul.f32 %v2710_v50, %v2710_v50 }
0x13d5   :  { %v2714_v29 = vsel %vm31_vm0, %v2712_v52, 0.0  ;;  %v2713_v53 = vmul.f32 %v2711_v47, %v2711_v47 }
0x13d6   :  { %2715 = vadd.xlane.f32.xlu0 %v2714_v29 }
0x13d7   :  { %v2717_v30 = vsel %vm31_vm0, %v2713_v53, 0.0 }
0x13d8   :  { %2718 = vadd.xlane.f32.xlu1 %v2717_v30 }
0x1463   :  { %v2716_v44 = vpop.xlane.xlu0 %2715 }
0x1464   :  { %v2720_v56 = vmul.f32 0.03125, %v2716_v44 }
0x1465   :  { %v2719_v46 = vpop.xlane.xlu1 %2718 }
0x1466   :  { %v2722_v40 = vadd.f32 1e-12, %v2720_v56  ;;  %v2721_v57 = vmul.f32 0.03125, %v2719_v46 }
0x1468   :  { %3561 = vrsqrt.f32 %v2722_v40  ;;  %v2723_v10 = vadd.f32 1e-12, %v2721_v57 }
0x146a   :  { %3563 = vrsqrt.f32 %v2723_v10 }
0x1472   :  { %v3562_v58 = vpop.eup %3561 }
0x1473   :  { %v2726_v60 = vmul.f32 %v3562_v58, %v2710_v50 }
0x1474   :  { %v3564_v43 = vpop.eup %3563 }
0x1475   :  { %v2732_v61 = vmul.f32 %v3027_v59, %v2726_v60  ;;  %v2727_v62 = vmul.f32 %v3564_v43, %v2711_v47 }
0x1477   :  { %v2733_v31 = vmul.f32 %v3027_v59, %v2727_v62  ;;  %v2738_v0 = vadd.f32 %v3028_v63, %v2732_v61  ;;  %v3051_v62 = vld [vmem:[%s4222_s2 + $0x10] ss:$0 sm:$0xff] }
0x1479   :  { %v2739_v32 = vadd.f32 %v3028_v63, %v2733_v31 }
0x147b   :  { %v2740_v1 = vpack.c.bf16 %v2739_v32, %v2738_v0 }
0x147d   :  { %3436 = vmatmul.mubr.msk.bf16.vlgmr.msra.gmra.mrb[92].mxu1 %vm31_vm0, %v2740_v1 }
0x1550   :  { %v2799_v11 = vpop.f32.mrb[92].mxu1 }
0x1551   :  { %v2800_v7 = vadd.f32 %v3033_v6, %v2799_v11  ;;  %v3437_v8 = vpop.f32.mrb[93].mxu1 }
0x1552   :  { %v2802_v9 = vpop.f32.mrb[94].mxu1 }
0x1553   :  { %v2808_v12 = vmul.f32 0.044715, %v2800_v7  ;;  %v2803_v13 = vadd.f32 %v3033_v6, %v2802_v9  ;;  %v3438_v14 = vpop.f32.mrb[95].mxu1  ;;  %v2806_v27 = vmul.f32 0.5, %v2800_v7 }
0x1555   :  { %v2810_v16 = vmul.f32 %v2808_v12, %v2800_v7  ;;  %v2809_v17 = vmul.f32 0.044715, %v2803_v13  ;;  %v2807_v28 = vmul.f32 0.5, %v2803_v13 }
0x1557   :  { %v2812_v18 = vmul.f32 %v2810_v16, %v2800_v7  ;;  %v2811_v19 = vmul.f32 %v2809_v17, %v2803_v13 }
0x1559   :  { %v2814_v20 = vadd.f32 %v2812_v18, %v2800_v7  ;;  %v2813_v21 = vmul.f32 %v2811_v19, %v2803_v13 }
0x155b   :  { %v2816_v22 = vmul.f32 0.7978846, %v2814_v20  ;;  %v2815_v15 = vadd.f32 %v2813_v21, %v2803_v13 }
0x155d   :  { %3565 = vtanh.f32 %v2816_v22  ;;  %v2817_v23 = vmul.f32 0.7978846, %v2815_v15 }
0x155f   :  { %3567 = vtanh.f32 %v2817_v23 }
0x1567   :  { %v3566_v24 = vpop.eup %3565 }
0x1568   :  { %v2820_v25 = vadd.f32 1.0, %v3566_v24 }
0x1569   :  { %v3568_v26 = vpop.eup %3567 }
0x156a   :  { %v2821_v33 = vadd.f32 1.0, %v3568_v26  ;;  %v2822_v34 = vmul.f32 %v2820_v25, %v2806_v27 }
0x156c   :  { %v2823_v35 = vmul.f32 %v2821_v33, %v2807_v28 }
0x156e   :  { %v2824_v36 = vpack.c.bf16 %v2823_v35, %v2822_v34 }
0x1570   :  { %3448 = vmatmul.mubr.msk.bf16.vlgmr.msra.gmra.mrb[84].mxu0 %vm1440_vm4, %v2824_v36 }
0x1643   :  { %v2899_v38 = vpop.f32.mrb[84].mxu0 }
0x1644   :  { %v2900_v39 = vadd.f32 %v3045_v37, %v2899_v38  ;;  %v3449_v42 = vpop.f32.mrb[85].mxu0 }
0x1645   :  { %v2902_v45 = vpop.f32.mrb[86].mxu0 }
0x1646   :  { %v2903_v41 = vadd.f32 %v3045_v37, %v2902_v45  ;;  %v3450_v48 = vpop.f32.mrb[87].mxu0  ;;  %v2906_v49 = vadd.f32 %v2900_v39, %v2738_v0  ;;  %v3052_v0 = vld [vmem:[%s4222_s2 + $0x11] ss:$0 sm:$0xff] }
0x1648   :  { %v2908_v50 = vsel %vm31_vm0, %v2906_v49, 0.0  ;;  %v2907_v51 = vadd.f32 %v2903_v41, %v2739_v32 }
0x1649   :  { %2909 = vadd.xlane.f32.xlu0 %v2908_v50 }
0x164a   :  { %v2911_v47 = vsel %vm31_vm0, %v2907_v51, 0.0 }
0x164b   :  { %2912 = vadd.xlane.f32.xlu1 %v2911_v47 }
0x16d6   :  { %v2910_v52 = vpop.xlane.xlu0 %2909 }
0x16d7   :  { %v2914_v29 = vmul.f32 0.03125, %v2910_v52 }
0x16d8   :  { %v2913_v53 = vpop.xlane.xlu1 %2912 }
0x16d9   :  { %v2916_v30 = vsub.f32 %v2906_v49, %v2914_v29  ;;  %v2915_v54 = vmul.f32 0.03125, %v2913_v53 }
0x16db   :  { %v2917_v55 = vsub.f32 %v2907_v51, %v2915_v54  ;;  %v2918_v44 = vmul.f32 %v2916_v30, %v2916_v30 }
0x16dd   :  { %v2920_v56 = vsel %vm31_vm0, %v2918_v44, 0.0  ;;  %v2919_v46 = vmul.f32 %v2917_v55, %v2917_v55 }
0x16de   :  { %2921 = vadd.xlane.f32.xlu0 %v2920_v56 }
0x16df   :  { %v2923_v40 = vsel %vm31_vm0, %v2919_v46, 0.0 }
0x16e0   :  { %2924 = vadd.xlane.f32.xlu1 %v2923_v40 }
0x176b   :  { %v2922_v57 = vpop.xlane.xlu0 %2921 }
0x176c   :  { %v2926_v10 = vmul.f32 0.03125, %v2922_v57 }
0x176d   :  { %v2925_v58 = vpop.xlane.xlu1 %2924 }
0x176e   :  { %v2928_v59 = vadd.f32 1e-12, %v2926_v10  ;;  %v2927_v60 = vmul.f32 0.03125, %v2925_v58 }
0x1770   :  { %3569 = vrsqrt.f32 %v2928_v59  ;;  %v2929_v43 = vadd.f32 1e-12, %v2927_v60 }
0x1772   :  { %3571 = vrsqrt.f32 %v2929_v43 }
0x177a   :  { %v3570_v61 = vpop.eup %3569 }
0x177b   :  { %v2932_v63 = vmul.f32 %v3570_v61, %v2916_v30 }
0x177c   :  { %v3572_v31 = vpop.eup %3571 }
0x177d   :  { %v2938_v32 = vmul.f32 %v3051_v62, %v2932_v63  ;;  %v2933_v1 = vmul.f32 %v3572_v31, %v2917_v55 }
0x177f   :  { %v2944_v2 = vadd.f32 %v3052_v0, %v2938_v32  ;;  %v2939_v3 = vmul.f32 %v3051_v62, %v2933_v1 }
0x1781   :  { %2946 = vst.msk [vmem:[%s4227_s7] sm:$0xff] %vm31_vm0, %v2944_v2  ;;  %v2945_v4 = vadd.f32 %v3052_v0, %v2939_v3 }
0x1783   :  { %2947 = vst.msk [vmem:[%s4227_s7 + $0x8] sm:$0xff] %vm31_vm0, %v2945_v4 }

</bundles_post_ra>
